<compile_context>
chip_gen: v5e
topology: v5e:2x2
jax: 0.10.0
libtpu: 0.0.40
codegen_flags: <defaults>
</compile_context>

<pallas_src>
import jax
import jax.numpy as jnp
from jax.experimental import pallas as pl
from jax.experimental.pallas import tpu as pltpu

# Problem sizes (TPU-tile friendly):
NUM_IN = 256            # = X.size(1) * X.size(2) in the original script
NUM_F = 64              # bottleneck size
HID = 2 * NUM_F         # 128
ENC_PAD = 128           # lane-dense padding of the 64-wide bottleneck output
FUSED_N = ENC_PAD + HID # 256-wide fused matmul (fills the 256-lane MXU on v6e/v7x)
BATCH = 1024            # example batch (4 grid steps of TB -> pipelining visible)
TB = 256                # batch tile per grid step


def autoencoder_kernel(x_ref,
                       w1_ref, b1_ref,      # encoder layer 1: [NUM_IN, HID] bf16, [1, HID] f32
                       wcat_ref,            # fused  [w2_pad | w2@w3]: [HID, FUSED_N] bf16
                       b2_ref, b23_ref,     # [1, ENC_PAD] f32, [1, HID] f32
                       w4_ref, b4_ref,      # decoder layer 2: [HID, NUM_IN] bf16, [1, NUM_IN] f32
                       enc_ref, dec_ref):
    # Cast x to bf16 in-kernel (free VPU work; keeps x at 4 B/elt of HBM traffic
    # instead of a wrapper-side convert that would read+write it again).
    x = x_ref[...].astype(jnp.bfloat16)                               # (TB, NUM_IN)

    # Encoder layer 1: Linear -> Tanh (bf16 MXU, f32 accumulate / bias / tanh).
    h1 = jnp.tanh(
        jnp.dot(x, w1_ref[...], preferred_element_type=jnp.float32) + b1_ref[...]
    )                                                                 # f32 (TB, HID)

    # Fused 256-wide matmul: lanes [:128] -> (padded) encoder output,
    # lanes [128:] -> decoder hidden pre-activation (W23 = w2 @ w3 precomputed).
    y = jnp.dot(h1.astype(jnp.bfloat16), wcat_ref[...],
                preferred_element_type=jnp.float32)                   # f32 (TB, FUSED_N)
    enc = y[:, :ENC_PAD] + b2_ref[...]                                # f32 (TB, ENC_PAD)
    h2 = jnp.tanh(y[:, ENC_PAD:] + b23_ref[...])                      # f32 (TB, HID)

    # Decoder layer 2.
    dec = jnp.dot(h2.astype(jnp.bfloat16), w4_ref[...],
                  preferred_element_type=jnp.float32) + b4_ref[...]   # f32 (TB, NUM_IN)

    # bf16 stores: halve HBM writeback (the dominant cost), lane-dense (128/256 wide).
    enc_ref[...] = enc.astype(enc_ref.dtype)
    dec_ref[...] = dec.astype(dec_ref.dtype)


def prepare_kernel_params(params):
    """One-time preprocessing, hoisted out of the per-call forward path.

    * weights cast to bf16 (MXU inputs); biases kept f32
    * encoder output padded 64 -> 128 lanes (zero columns/lanes keep math exact)
    * decoder's first Linear folded into the encoder's second one:
        W23 = w2 @ w3, b23 = b2 @ w3 + b3, Wcat = [w2_pad | W23]
    """
    w1 = params["w1"].astype(jnp.bfloat16)
    b1 = params["b1"].astype(jnp.float32)

    w2p = jnp.zeros((HID, ENC_PAD), jnp.float32).at[:, :NUM_F].set(params["w2"])
    b2p = jnp.zeros((1, ENC_PAD), jnp.float32).at[:, :NUM_F].set(params["b2"])
    w23 = params["w2"] @ params["w3"]                          # (HID, HID) f32
    b23 = params["b2"] @ params["w3"] + params["b3"]           # (1, HID)  f32
    wcat = jnp.concatenate([w2p, w23], axis=1).astype(jnp.bfloat16)   # (HID, FUSED_N)

    w4 = params["w4"].astype(jnp.bfloat16)
    b4 = params["b4"].astype(jnp.float32)
    return dict(w1=w1, b1=b1, wcat=wcat, b2p=b2p, b23=b23.astype(jnp.float32),
                w4=w4, b4=b4)


def autoencoder_forward(x, prepared, *, tb=TB):
    """x: [B, NUM_IN] float32. Returns (encoded [B, NUM_F], decoded [B, NUM_IN]) bf16."""
    B = x.shape[0]
    pad = (-B) % tb
    xp = jnp.pad(x, ((0, pad), (0, 0))) if pad else x   # no-op when already aligned
    Bp = B + pad

    p = prepared

    # Weights/biases: constant block index -> fetched once, VMEM-resident.
    resident = lambda shape: pl.BlockSpec(shape, lambda i: (0, 0))
    # Activations/outputs: tiled over the batch grid axis.
    batched = lambda shape: pl.BlockSpec(shape, lambda i: (i, 0))

    weight_bytes = sum(int(a.size) * a.dtype.itemsize for a in p.values())
    bytes_accessed = (
        Bp * NUM_IN * 4          # x (f32 in)
        + weight_bytes           # resident weights/biases (fetched once)
        + Bp * ENC_PAD * 2       # enc (bf16 out)
        + Bp * NUM_IN * 2        # dec (bf16 out)
    )
    flops = 2 * Bp * (NUM_IN * HID + HID * FUSED_N + HID * NUM_IN)

    enc_pad, dec = pl.pallas_call(
        autoencoder_kernel,
        out_shape=(
            jax.ShapeDtypeStruct((Bp, ENC_PAD), jnp.bfloat16),
            jax.ShapeDtypeStruct((Bp, NUM_IN), jnp.bfloat16),
        ),
        grid=(Bp // tb,),
        in_specs=[
            batched((tb, NUM_IN)),                                 # x tile (f32)
            resident((NUM_IN, HID)), resident((1, HID)),           # w1, b1
            resident((HID, FUSED_N)),                              # fused [w2_pad | w2@w3]
            resident((1, ENC_PAD)), resident((1, HID)),            # b2 (padded), b23
            resident((HID, NUM_IN)), resident((1, NUM_IN)),        # w4, b4
        ],
        out_specs=(
            batched((tb, ENC_PAD)),
            batched((tb, NUM_IN)),
        ),
        compiler_params=pltpu.CompilerParams(
            dimension_semantics=("parallel",),                     # v7x: both TensorCores
        ),
        cost_estimate=pl.CostEstimate(
            flops=flops,
            transcendentals=Bp * 2 * HID,
            bytes_accessed=bytes_accessed,
        ),
    )(xp, p["w1"], p["b1"], p["wcat"], p["b2p"], p["b23"], p["w4"], p["b4"])

    return enc_pad[:B, :NUM_F], dec[:B]


def init_params(key):
    """Deterministic parameter init (shapes match the torch module, stored transposed)."""
    ks = jax.random.split(key, 8)

    def lin(kw, kb, fan_in, fan_out):
        # torch.nn.Linear default init: U(-1/sqrt(fan_in), 1/sqrt(fan_in))
        bound = 1.0 / jnp.sqrt(fan_in)
        w = jax.random.uniform(kw, (fan_in, fan_out), jnp.float32, -bound, bound)
        b = jax.random.uniform(kb, (1, fan_out), jnp.float32, -bound, bound)
        return w, b

    w1, b1 = lin(ks[0], ks[1], NUM_IN, HID)
    w2, b2 = lin(ks[2], ks[3], HID, NUM_F)
    w3, b3 = lin(ks[4], ks[5], NUM_F, HID)
    w4, b4 = lin(ks[6], ks[7], HID, NUM_IN)
    return dict(w1=w1, b1=b1, w2=w2, b2=b2, w3=w3, b3=b3, w4=w4, b4=b4)


def reference_forward(x, p):
    """Module-faithful forward (f32 activations, unfused matmuls)."""
    h1 = jnp.tanh(x @ p["w1"] + p["b1"])
    enc = h1 @ p["w2"] + p["b2"]
    h2 = jnp.tanh(enc @ p["w3"] + p["b3"])
    dec = h2 @ p["w4"] + p["b4"]
    return enc, dec


if __name__ == "__main__":
    key = jax.random.PRNGKey(0)
    k_x, k_p = jax.random.split(key)

    x = jax.random.normal(k_x, (BATCH, NUM_IN), dtype=jnp.float32)
    params = init_params(k_p)
    prepared = prepare_kernel_params(params)   # hoisted: computed once, reused per call

    enc, dec = autoencoder_forward(x, prepared)
    jax.block_until_ready((enc, dec))

    assert enc.shape == (BATCH, NUM_F) and dec.shape == (BATCH, NUM_IN)
    assert enc.dtype == jnp.bfloat16 and dec.dtype == jnp.bfloat16

    # Correctness check against the module-faithful f32 forward on the same
    # bf16-quantized weights/input.  Tolerance covers bf16 rounding of the
    # intermediate activations, the bf16 output stores, and the w2@w3 fusion
    # (an associativity-only change).
    q = lambda a: a.astype(jnp.bfloat16).astype(jnp.float32)
    qp = {k: (q(v) if k.startswith("w") else v) for k, v in params.items()}
    enc_ref, dec_ref = reference_forward(q(x), qp)

    enc_f32 = enc.astype(jnp.float32)
    dec_f32 = dec.astype(jnp.float32)
    assert jnp.allclose(enc_f32, enc_ref, atol=7.5e-2, rtol=7.5e-2), \
        float(jnp.max(jnp.abs(enc_f32 - enc_ref)))
    assert jnp.allclose(dec_f32, dec_ref, atol=7.5e-2, rtol=7.5e-2), \
        float(jnp.max(jnp.abs(dec_f32 - dec_ref)))

    print("KERNEL_OK")
</pallas_src>

<mosaic_0001>
module attributes {stable_mosaic.version = 11 : i64} {
  func.func @autoencoder_kernel(%arg0: i32, %arg1: memref<256x256xf32, #tpu.memory_space<vmem>>, %arg2: memref<256x128xbf16, #tpu.memory_space<vmem>>, %arg3: memref<1x128xf32, #tpu.memory_space<vmem>>, %arg4: memref<128x256xbf16, #tpu.memory_space<vmem>>, %arg5: memref<1x128xf32, #tpu.memory_space<vmem>>, %arg6: memref<1x128xf32, #tpu.memory_space<vmem>>, %arg7: memref<128x256xbf16, #tpu.memory_space<vmem>>, %arg8: memref<1x256xf32, #tpu.memory_space<vmem>>, %arg9: memref<256x128xbf16, #tpu.memory_space<vmem>>, %arg10: memref<256x256xbf16, #tpu.memory_space<vmem>>) attributes {dimension_semantics = [#tpu.dimension_semantics<parallel>], iteration_bounds = array<i64: 4>, scalar_prefetch = 0 : i64, scratch_operands = 0 : i64, tpu.core_type = #tpu.core_type<tc>, window_params = [{transform_indices = @transform_0, window_bounds = array<i64: 256, 256>}, {pipeline_mode = #tpu.pipeline_mode<synchronous>, transform_indices = @transform_1, window_bounds = array<i64: 256, 128>}, {pipeline_mode = #tpu.pipeline_mode<synchronous>, transform_indices = @transform_2, window_bounds = array<i64: 1, 128>}, {pipeline_mode = #tpu.pipeline_mode<synchronous>, transform_indices = @transform_3, window_bounds = array<i64: 128, 256>}, {pipeline_mode = #tpu.pipeline_mode<synchronous>, transform_indices = @transform_4, window_bounds = array<i64: 1, 128>}, {pipeline_mode = #tpu.pipeline_mode<synchronous>, transform_indices = @transform_5, window_bounds = array<i64: 1, 128>}, {pipeline_mode = #tpu.pipeline_mode<synchronous>, transform_indices = @transform_6, window_bounds = array<i64: 128, 256>}, {pipeline_mode = #tpu.pipeline_mode<synchronous>, transform_indices = @transform_7, window_bounds = array<i64: 1, 256>}, {transform_indices = @transform_8, window_bounds = array<i64: 256, 128>}, {transform_indices = @transform_9, window_bounds = array<i64: 256, 256>}]} {
    %c0 = arith.constant 0 : index
    %c0_0 = arith.constant 0 : index
    %0 = vector.load %arg1[%c0, %c0_0] : memref<256x256xf32, #tpu.memory_space<vmem>>, vector<256x256xf32>
    %1 = arith.truncf %0 : vector<256x256xf32> to vector<256x256xbf16>
    %c0_1 = arith.constant 0 : index
    %c0_2 = arith.constant 0 : index
    %2 = vector.load %arg2[%c0_1, %c0_2] : memref<256x128xbf16, #tpu.memory_space<vmem>>, vector<256x128xbf16>
    %cst = arith.constant dense<0.000000e+00> : vector<256x128xf32>
    %3 = tpu.matmul %1, %2, %cst {dimension_numbers = #tpu.dot_dimension_numbers<[1], [0], [0], [1], [0, 0, 1, 1], [], []>} : vector<256x256xbf16>, vector<256x128xbf16>, vector<256x128xf32> -> vector<256x128xf32>
    %c0_3 = arith.constant 0 : index
    %c0_4 = arith.constant 0 : index
    %4 = vector.load %arg3[%c0_3, %c0_4] : memref<1x128xf32, #tpu.memory_space<vmem>>, vector<1x128xf32>
    %5 = vector.broadcast %4 : vector<1x128xf32> to vector<256x128xf32>
    %6 = arith.addf %3, %5 : vector<256x128xf32>
    %7 = math.tanh %6 : vector<256x128xf32>
    %8 = arith.truncf %7 : vector<256x128xf32> to vector<256x128xbf16>
    %c0_5 = arith.constant 0 : index
    %c0_6 = arith.constant 0 : index
    %9 = vector.load %arg4[%c0_5, %c0_6] : memref<128x256xbf16, #tpu.memory_space<vmem>>, vector<128x256xbf16>
    %cst_7 = arith.constant dense<0.000000e+00> : vector<256x256xf32>
    %10 = tpu.matmul %8, %9, %cst_7 {dimension_numbers = #tpu.dot_dimension_numbers<[1], [0], [0], [1], [0, 0, 1, 1], [], []>} : vector<256x128xbf16>, vector<128x256xbf16>, vector<256x256xf32> -> vector<256x256xf32>
    %11 = vector.extract_strided_slice %10 {offsets = [0, 0], sizes = [256, 128], strides = [1, 1]} : vector<256x256xf32> to vector<256x128xf32>
    %c0_8 = arith.constant 0 : index
    %c0_9 = arith.constant 0 : index
    %12 = vector.load %arg5[%c0_8, %c0_9] : memref<1x128xf32, #tpu.memory_space<vmem>>, vector<1x128xf32>
    %13 = vector.broadcast %12 : vector<1x128xf32> to vector<256x128xf32>
    %14 = arith.addf %11, %13 : vector<256x128xf32>
    %15 = vector.extract_strided_slice %10 {offsets = [0, 128], sizes = [256, 128], strides = [1, 1]} : vector<256x256xf32> to vector<256x128xf32>
    %c0_10 = arith.constant 0 : index
    %c0_11 = arith.constant 0 : index
    %16 = vector.load %arg6[%c0_10, %c0_11] : memref<1x128xf32, #tpu.memory_space<vmem>>, vector<1x128xf32>
    %17 = vector.broadcast %16 : vector<1x128xf32> to vector<256x128xf32>
    %18 = arith.addf %15, %17 : vector<256x128xf32>
    %19 = math.tanh %18 : vector<256x128xf32>
    %20 = arith.truncf %19 : vector<256x128xf32> to vector<256x128xbf16>
    %c0_12 = arith.constant 0 : index
    %c0_13 = arith.constant 0 : index
    %21 = vector.load %arg7[%c0_12, %c0_13] : memref<128x256xbf16, #tpu.memory_space<vmem>>, vector<128x256xbf16>
    %cst_14 = arith.constant dense<0.000000e+00> : vector<256x256xf32>
    %22 = tpu.matmul %20, %21, %cst_14 {dimension_numbers = #tpu.dot_dimension_numbers<[1], [0], [0], [1], [0, 0, 1, 1], [], []>} : vector<256x128xbf16>, vector<128x256xbf16>, vector<256x256xf32> -> vector<256x256xf32>
    %c0_15 = arith.constant 0 : index
    %c0_16 = arith.constant 0 : index
    %23 = vector.load %arg8[%c0_15, %c0_16] : memref<1x256xf32, #tpu.memory_space<vmem>>, vector<1x256xf32>
    %24 = vector.broadcast %23 : vector<1x256xf32> to vector<256x256xf32>
    %25 = arith.addf %22, %24 : vector<256x256xf32>
    %26 = arith.truncf %14 : vector<256x128xf32> to vector<256x128xbf16>
    %c0_17 = arith.constant 0 : index
    %c0_18 = arith.constant 0 : index
    %27 = vector.load %arg9[%c0_17, %c0_18] : memref<256x128xbf16, #tpu.memory_space<vmem>>, vector<256x128xbf16>
    tpu.vector_store %arg9[%c0_17, %c0_18], %26 {strides = array<i32>} : memref<256x128xbf16, #tpu.memory_space<vmem>>, vector<256x128xbf16>,
    %28 = arith.truncf %25 : vector<256x256xf32> to vector<256x256xbf16>
    %c0_19 = arith.constant 0 : index
    %c0_20 = arith.constant 0 : index
    %29 = vector.load %arg10[%c0_19, %c0_20] : memref<256x256xbf16, #tpu.memory_space<vmem>>, vector<256x256xbf16>
    tpu.vector_store %arg10[%c0_19, %c0_20], %28 {strides = array<i32>} : memref<256x256xbf16, #tpu.memory_space<vmem>>, vector<256x256xbf16>,
    return
  }
  func.func @transform_0(%arg0: i32) -> (i32, i32) {
    %c0_i32 = arith.constant 0 : i32
    %c0_i32_0 = arith.constant 0 : i32
    return %arg0, %c0_i32 : i32, i32
  }
  func.func @transform_1(%arg0: i32) -> (i32, i32) {
    %c0_i32 = arith.constant 0 : i32
    %c0_i32_0 = arith.constant 0 : i32
    %c0_i32_1 = arith.constant 0 : i32
    return %c0_i32, %c0_i32_0 : i32, i32
  }
  func.func @transform_2(%arg0: i32) -> (i32, i32) {
    %c0_i32 = arith.constant 0 : i32
    %c0_i32_0 = arith.constant 0 : i32
    %c0_i32_1 = arith.constant 0 : i32
    return %c0_i32, %c0_i32_0 : i32, i32
  }
  func.func @transform_3(%arg0: i32) -> (i32, i32) {
    %c0_i32 = arith.constant 0 : i32
    %c0_i32_0 = arith.constant 0 : i32
    %c0_i32_1 = arith.constant 0 : i32
    return %c0_i32, %c0_i32_0 : i32, i32
  }
  func.func @transform_4(%arg0: i32) -> (i32, i32) {
    %c0_i32 = arith.constant 0 : i32
    %c0_i32_0 = arith.constant 0 : i32
    %c0_i32_1 = arith.constant 0 : i32
    return %c0_i32, %c0_i32_0 : i32, i32
  }
  func.func @transform_5(%arg0: i32) -> (i32, i32) {
    %c0_i32 = arith.constant 0 : i32
    %c0_i32_0 = arith.constant 0 : i32
    %c0_i32_1 = arith.constant 0 : i32
    return %c0_i32, %c0_i32_0 : i32, i32
  }
  func.func @transform_6(%arg0: i32) -> (i32, i32) {
    %c0_i32 = arith.constant 0 : i32
    %c0_i32_0 = arith.constant 0 : i32
    %c0_i32_1 = arith.constant 0 : i32
    return %c0_i32, %c0_i32_0 : i32, i32
  }
  func.func @transform_7(%arg0: i32) -> (i32, i32) {
    %c0_i32 = arith.constant 0 : i32
    %c0_i32_0 = arith.constant 0 : i32
    %c0_i32_1 = arith.constant 0 : i32
    return %c0_i32, %c0_i32_0 : i32, i32
  }
  func.func @transform_8(%arg0: i32) -> (i32, i32) {
    %c0_i32 = arith.constant 0 : i32
    %c0_i32_0 = arith.constant 0 : i32
    return %arg0, %c0_i32 : i32, i32
  }
  func.func @transform_9(%arg0: i32) -> (i32, i32) {
    %c0_i32 = arith.constant 0 : i32
    %c0_i32_0 = arith.constant 0 : i32
    return %arg0, %c0_i32 : i32, i32
  }
}

</mosaic_0001>

<bundles_post_ra>
// kernel: tpu_custom_call.1
= control target key start
LH: loop header
LB: loop body
LE: loop exit
PB: predicated region body
PF: predicated region fallthrough
CT: control target
= control target key end

     0   :  { %s3359_s0 = inlined_call_operand.hbm [shape: f32[1024,256], index: 0, kind: input, shape index: {}]   ;;  %s3360_s1 = inlined_call_operand.hbm [shape: bf16[256,128], index: 1, kind: input, shape index: {}]   ;;  %s3361_s2 = inlined_call_operand.vmem [shape: f32[1,128], index: 2, kind: input, shape index: {}]   ;;  %s3362_s3 = inlined_call_operand.hbm [shape: bf16[128,256], index: 3, kind: input, shape index: {}]   ;;  %s3363_s4 = inlined_call_operand.hbm [shape: f32[1,128], index: 4, kind: input, shape index: {}]   ;;  %s3364_s5 = inlined_call_operand.vmem [shape: f32[1,128], index: 5, kind: input, shape index: {}]   ;;  %s3365_s6 = inlined_call_operand.hbm [shape: bf16[128,256], index: 6, kind: input, shape index: {}]   ;;  %s3366_s7 = inlined_call_operand.vmem [shape: f32[1,256], index: 7, kind: input, shape index: {}]   ;;  %s3367_s8 = inlined_call_operand.hbm [shape: bf16[1024,128], index: 8, kind: output, shape index: {0}]   ;;  %s3368_s9 = inlined_call_operand.hbm [shape: bf16[1024,256], index: 9, kind: output, shape index: {1}]  }
   0x1   :  { %3369 = sst [smem:[#allocation19_spill]] %s3360_s1 }
   0x2   :  { %3370 = sst [smem:[#allocation20_spill]] %s3362_s3 }
   0x3   :  { %3371 = sst [smem:[#allocation21_spill]] %s3363_s4 }
   0x4   :  { %15 = vsyncpa [#allocation3], 0 }
   0x5   :  { %17 = vsyncpa [#allocation3 + $0x1], 0 }
   0x6   :  { %18 = vsyncpa [#allocation6], 0 }
   0x7   :  { %19 = vsyncpa [#allocation9], 0 }
   0x8   :  { %20 = vsyncpa [#allocation4], 0 }
   0x9   :  { %22 = vsyncpa [#allocation4 + $0x1], 0 }
   0xa   :  { %23 = vsyncpa [#allocation13], 0 }
   0xb   :  { %25 = vsyncpa [#allocation13 + $0x1], 0  ;;  %s2810_s30 = smov 0   ;;  %s2812_s10 = smov 0  }
   0xc   :  { %s2814_s11 = smov 0   ;;  %s2816_s12 = smov 0  }
   0xd LB: > { %s2831_s13 = sadd.s32 4294967295, %s2744_s12   ;;  %s1871_s14 = sadd.s32 4294967294, %s2744_s12   ;;  %s2744_s12 = sphi %s2816_s12, %s3384_s12   ;;  %s2740_s11 = sphi %s2814_s11, %s3383_s11   ;;  %s2736_s10 = sphi %s2812_s10, %s3382_s10   ;;  %s2732_s30 = sphi %s2810_s30, %s3381_s30  }
   0xe   : > { %p51_p0 = scmp.ne.s32.totalorder %s2736_s10, %s2732_s30  ;;  %p52_p1 = scmp.eq.s32.totalorder %s2831_s13, 0 }
   0xf   : > { %p222_p2 = scmp.eq.s32.totalorder %s2831_s13, 3  ;;  %p228_p3 = scmp.eq.s32.totalorder %s1871_s14, 3 }
  0x10   : > { %p2840_p4 = por %p52_p1, %p51_p0  ;;  %p1872_p5 = scmp.ge.s32.totalorder %s2744_s12, 1 }
  0x11   : > { %p2845_p6 = por %p228_p3, %p51_p0  ;;  %p261_p7 = scmp.lt.s32.totalorder %s2744_s12, 5 }
  0x12   : > { %s3374_s1 = sld [smem:[#allocation19_spill]]  ;;  %s2746_s21 = smov [#allocation5]  }
  0x13   : > { %p2853_p8 = pnand %p1872_p5, %p261_p7  ;;  %s274_s22 = sshll.u32 %s2746_s21, 4  ;;  %s275_s22 = int_to_ptr.vmem [resolvable:$true] %s274_s22 }
  0x14   : > { %s3377_s4 = sld [smem:[#allocation21_spill]]  ;;  %s2747_s27 = smov 64  }
  0x15   : > { %p2277_p9 = pneg %p2853_p8  ;;  %s2748_s28 = smov 4  }
  0x16   : > { %s2749_s29 = smov [#allocation8]   ;;  %s3378_s3 = sld [smem:[#allocation20_spill]] }
  0x17   : > { %p2861_p10 = pnand %p2277_p9, %p52_p1  ;;  %s306_s14 = sshll.u32 %s2749_s29, 4  ;;  %s307_s14 = int_to_ptr.vmem [resolvable:$true] %s306_s14 }
  0x18   : > { %s272_s19 = sshll.u32 %s3374_s1, 4  ;;  %s2750_s24 = smov [#allocation7]   ;;  %s273_s19 = int_to_ptr.hbm [resolvable:$true] %s272_s19 }
  0x19   : > { %2280 = dma.hbm_to_vmem [thread:$0]  (!%p2861_p10), %s273_s19, 2048, %s275_s22, [#allocation6], %s2747_s27, %s2747_s27, %s2748_s28  }
  0x1a   : > { %s304_s26 = sshll.u32 %s3377_s4, 4  ;;  %s291_s25 = sshll.u32 %s2750_s24, 4  ;;  %s305_s26 = int_to_ptr.hbm [resolvable:$true] %s304_s26  ;;  %s292_s25 = int_to_ptr.vmem [resolvable:$true] %s291_s25 }
  0x1b   : > { %2286 = dma.hbm_to_vmem [thread:$0]  (!%p2861_p10), %s305_s26, 16, %s307_s14, [#allocation9]  }
  0x1c   : > { %s289_s21 = sshll.u32 %s3378_s3, 4  ;;  %s318_s27 = sshll.u32 %s3365_s6, 4  ;;  %s290_s21 = int_to_ptr.hbm [resolvable:$true] %s289_s21  ;;  %s319_s27 = int_to_ptr.hbm [resolvable:$true] %s318_s27 }
  0x1d   : > { %s2751_s28 = smov 128   ;;  %s2752_s29 = smov 8  }
  0x1e   : > { %2283 = dma.hbm_to_vmem [thread:$0]  (!%p2861_p10), %s290_s21, 2048, %s292_s25, [#allocation6], %s2751_s28, %s2751_s28, %s2752_s29  }
  0x1f   : > { %s2753_s26 = smov [#allocation10]   ;;  %s2883_s17 = sadd.s32 1, %s2744_s12  }
  0x20   : > { %s320_s14 = sshll.u32 %s2753_s26, 4  ;;  %s38_s18 = sadd.s32 1, %s2740_s11  ;;  %s321_s14 = int_to_ptr.vmem [resolvable:$true] %s320_s14 }
  0x21   : > { %2289 = dma.hbm_to_vmem [thread:$0]  (!%p2861_p10), %s319_s27, 2048, %s321_s14, [#allocation9], %s2751_s28, %s2751_s28, %s2752_s29  }
  0x22   : > { %s35_s24 = ssub.s32 %s2744_s12, %s2883_s17  ;;  %p45_p11 = scmp.ne.s32.totalorder %s2740_s11, %s2736_s10 }
  0x23   : > { %p36_p12 = scmp.eq.s32.totalorder %s35_s24, 0  ;;  %p46_p13 = scmp.eq.s32.totalorder %s2744_s12, 0 }
  0x24   : > { %p2893_p0 = por %p222_p2, %p45_p11  ;;  %p2305_p3 = scmp.lt.s32.totalorder %s2744_s12, 4 }
  0x25   : > { %s2899_s21 = scalar_select %p36_p12, %s2740_s11, %s38_s18  }
  0x26   : > { %p47_p5 = por %p46_p13, %p45_p11  ;;  %s337_s25 = sand.u32 1, %s2740_s11  }
  0x27   : > { %s1878_s23 = sshll.u32 %s337_s25, 9  ;;  %s2092_s22 = sshll.u32 %s2744_s12, 9 }
  0x28   : > { %s347_s29 = scalar_lea.hbm %s3359_s0, %s2092_s22  ;;  %s341_s26 = scalar_lea.vmem [#allocation2], %s1878_s23 }
  0x29   : > { %s350_s14 = sshll.u32 %s341_s26, 4  ;;  %s348_s24 = sshll.u32 %s347_s29, 4  ;;  %s351_s14 = int_to_ptr.vmem [resolvable:$true] %s350_s14  ;;  %s349_s24 = int_to_ptr.hbm [resolvable:$true] %s348_s24 }
  0x2a   : > { %p2906_p2 = pnand %p2305_p3, %p47_p5  ;;  %s338_s18 = scalar_lea.sflag [#allocation3], %s337_s25 }
  0x2b   : > { %s2608_s3 = sshra.s32 %s349_s24, 4  ;;  %s2615_s27 = scalar_lea.hbm %s3359_s0, 2048  ;;  %s2609_s3 = int_to_ptr.hbm [resolvable:$true] %s2608_s3 }
  0x2c   : > { %s2610_s4 = scalar_lea.hbm %s2609_s3, 512  ;;  %p2612_p9 = pneg %p2906_p2 }
  0x2d   : > { %p2611_p7 = scmp.ne.s32.totalorder %s2609_s3, %s2610_s4  ;;  %p2616_p12 = scmp.lt.s32.totalorder %s2609_s3, %s3359_s0 }
  0x2e   : > { %p2617_p13 = scmp.lt.s32.totalorder %s2615_s27, %s2610_s4 }
  0x2f   : > { %p2613_p10 = pnand %p2612_p9, %p2611_p7 }
  0x30   : > { %p2618_p3 = por %p2617_p13, %p2616_p12 }
  0x31   : > { %p2614_p11 = pneg %p2613_p10 }
  0x33   : > { %p2619_p5 = pnand %p2618_p3, %p2614_p11 }
  0x35   : > { %2622 = shalt.err (!%p2619_p5)
}
  0x36   : > { %s2754_s25 = smov 256   ;;  %s2755_s26 = smov 16  }
  0x37   : > { %2293 = dma.hbm_to_vmem [thread:$0]  (!%p2906_p2), %s349_s24, 8192, %s351_s14, %s338_s18, %s2754_s25, %s2754_s25, %s2755_s26  }
  0x38   : > { %362 = sbr.rel (%p2853_p8) target bundleno = 779 (0x30b), region = 52  ;;  %s2923_s22 = sand.u32 (!%p2853_p8), 1, %s2736_s10  }
  0x39   : > { %s1883_s23 = sshll.u32 (!%p2853_p8), %s2923_s22, 9  ;;  %s365_s3 = scalar_lea.sflag (!%p2853_p8), [#allocation3], %s2923_s22 }
  0x3a   : > { %s2927_s4 = scalar_lea.vmem (!%p2853_p8), [#allocation2], %s1883_s23 }
  0x3d   : > { %2711 = dma.done.wait (%p2840_p4), %s365_s3, 8192  }
  0x3e   : > { %2713 = vsyncadd (%p2840_p4), %s365_s3, 4294959104 }
  0x3f   : > { %2715 = dma.done.wait (%p52_p1), [#allocation6], 4096  }
  0x40   : > { %2717 = vsyncadd (%p52_p1), [#allocation6], 4294963200 }
  0x41   : > { %2719 = dma.done.wait (%p52_p1), [#allocation9], 2064  }
  0x42   : > { %2721 = vsyncadd (%p52_p1), [#allocation9], 4294965232  ;;  %v2100_v0 = vld [vmem:[#allocation5 + $0x38] sm:$0xff]  ;;  %v2099_v2 = vld [vmem:[#allocation5 + $0x30] sm:$0xff]  ;;  %s1888_s24 = sshll.u32 %s2923_s22, 7  ;;  %s1889_s29 = sshll.u32 %s2923_s22, 8 }
  0x43   : > { %v2108_v1 = vld [vmem:[#allocation5 + $0x78] sm:$0xff]  ;;  %660 = vmatpush.bf16.msra.mxu0 %v2100_v0  ;;  %v2107_v3 = vld [vmem:[#allocation5 + $0x70] sm:$0xff]  ;;  %2239 = vmatpush.bf16.msra.mxu2 %v2100_v0  ;;  %v2098_v4 = vld [vmem:[#allocation5 + $0x28] sm:$0xff]  ;;  %s3104_s18 = scalar_lea.vmem [#allocation11], %s1888_s24  ;;  %s3180_s25 = scalar_lea.vmem [#allocation12], %s1889_s29 }
  0x44   : > { %749 = vmatpush.bf16.msra.mxu1 %v2108_v1  ;;  %2247 = vmatpush.bf16.msra.mxu3 %v2108_v1  ;;  %v2106_v5 = vld [vmem:[#allocation5 + $0x68] sm:$0xff]  ;;  %v2097_v6 = vld [vmem:[#allocation5 + $0x20] sm:$0xff]  ;;  %v2096_v8 = vld [vmem:[#allocation5 + $0x18] sm:$0xff]  ;;  %s2141_s26 = sshll.u32 %s2831_s13, 7  ;;  %s1706_s1 = sshll.u32 %s3104_s18, 4  ;;  %s1707_s1 = int_to_ptr.vmem [resolvable:$true] %s1706_s1 }
  0x45   : > { %v2105_v7 = vld [vmem:[#allocation5 + $0x60] sm:$0xff]  ;;  %v2104_v9 = vld [vmem:[#allocation5 + $0x58] sm:$0xff]  ;;  %v2095_v10 = vld [vmem:[#allocation5 + $0x10] sm:$0xff]  ;;  %s1689_s20 = scalar_lea.sflag [#allocation4], %s2923_s22  ;;  %s2658_s29 = scalar_lea.hbm %s3367_s8, 512 }
  0x46   : > { %v2103_v11 = vld [vmem:[#allocation5 + $0x50] sm:$0xff]  ;;  %v2094_v12 = vld [vmem:[#allocation5 + $0x8] sm:$0xff]  ;;  %v2093_v14 = vld [vmem:[#allocation5] sm:$0xff] }
  0x47   : > { %661 = vmatpush.bf16.msra.mxu0 %v2099_v2  ;;  %2240 = vmatpush.bf16.msra.mxu2 %v2099_v2  ;;  %v2102_v13 = vld [vmem:[#allocation5 + $0x48] sm:$0xff]  ;;  %v2101_v15 = vld [vmem:[#allocation5 + $0x40] sm:$0xff]  ;;  %v434_v17 = vld [vmem:[%s2927_s4 + $0x10] sm:$0xff] }
  0x48   : > { %750 = vmatpush.bf16.msra.mxu1 %v2107_v3  ;;  %2248 = vmatpush.bf16.msra.mxu3 %v2107_v3  ;;  %v432_v16 = vld [vmem:[%s2927_s4] sm:$0xff]  ;;  %v2123_v18 = vld [vmem:[#allocation7 + $0x74] sm:$0xf]  ;;  %v2014_v19 = vld [vmem:[#allocation7 + $0x78] sm:$0xf0] }
  0x49   : > { %v433_v20 = vld [vmem:[%s2927_s4 + $0x8] sm:$0xff]  ;;  %v435_v21 = vld [vmem:[%s2927_s4 + $0x18] sm:$0xff]  ;;  %v464_v22 = vld [vmem:[%s2927_s4 + $0x100] sm:$0xff]  ;;  %v2017_v26 = vor.u32 %v2123_v18, %v2014_v19  ;;  %v496_v27 = vpack.c.bf16 %v434_v17, %v432_v16 }
  0x4a   : > { %v466_v23 = vld [vmem:[%s2927_s4 + $0x110] sm:$0xff]  ;;  %v465_v24 = vld [vmem:[%s2927_s4 + $0x108] sm:$0xff]  ;;  %v467_v25 = vld [vmem:[%s2927_s4 + $0x118] sm:$0xff]  ;;  %v497_v28 = vpack.c.bf16 %v435_v21, %v433_v20 }
  0x4b   : > { %662 = vmatpush.bf16.msra.mxu0 %v2098_v4  ;;  %2241 = vmatpush.bf16.msra.mxu2 %v2098_v4  ;;  %v512_v29 = vpack.c.bf16 %v466_v23, %v464_v22  ;;  %v513_v30 = vpack.c.bf16 %v467_v25, %v465_v24  ;;  %v2121_v31 = vld [vmem:[#allocation7 + $0x64] sm:$0xf]  ;;  %v2006_v32 = vld [vmem:[#allocation7 + $0x68] sm:$0xf0]  ;;  %v438_v35 = vld [vmem:[%s2927_s4 + $0x30] sm:$0xff] }
  0x4c   : > { %751 = vmatpush.bf16.msra.mxu1 %v2106_v5  ;;  %2249 = vmatpush.bf16.msra.mxu3 %v2106_v5  ;;  %v2009_v33 = vor.u32 %v2121_v31, %v2006_v32  ;;  %v436_v34 = vld [vmem:[%s2927_s4 + $0x20] sm:$0xff]  ;;  %v437_v36 = vld [vmem:[%s2927_s4 + $0x28] sm:$0xff]  ;;  %v439_v37 = vld [vmem:[%s2927_s4 + $0x38] sm:$0xff] }
  0x4d   : > { %v468_v38 = vld [vmem:[%s2927_s4 + $0x120] sm:$0xff]  ;;  %v470_v39 = vld [vmem:[%s2927_s4 + $0x130] sm:$0xff]  ;;  %v469_v40 = vld [vmem:[%s2927_s4 + $0x128] sm:$0xff]  ;;  %v498_v42 = vpack.c.bf16 %v438_v35, %v436_v34  ;;  %v499_v43 = vpack.c.bf16 %v439_v37, %v437_v36 }
  0x4e   : > { %v471_v41 = vld [vmem:[%s2927_s4 + $0x138] sm:$0xff]  ;;  %v514_v44 = vpack.c.bf16 %v470_v39, %v468_v38  ;;  %v2119_v46 = vld [vmem:[#allocation7 + $0x54] sm:$0xf]  ;;  %v440_v49 = vld [vmem:[%s2927_s4 + $0x40] sm:$0xff] }
  0x4f   : > { %663 = vmatpush.bf16.msra.mxu0 %v2097_v6  ;;  %2242 = vmatpush.bf16.msra.mxu2 %v2097_v6  ;;  %v515_v45 = vpack.c.bf16 %v471_v41, %v469_v40  ;;  %v1998_v47 = vld [vmem:[#allocation7 + $0x58] sm:$0xf0]  ;;  %v442_v50 = vld [vmem:[%s2927_s4 + $0x50] sm:$0xff]  ;;  %v441_v51 = vld [vmem:[%s2927_s4 + $0x48] sm:$0xff] }
  0x50   : > { %752 = vmatpush.bf16.msra.mxu1 %v2105_v7  ;;  %2250 = vmatpush.bf16.msra.mxu3 %v2105_v7  ;;  %v2001_v48 = vor.u32 %v2119_v46, %v1998_v47  ;;  %v443_v52 = vld [vmem:[%s2927_s4 + $0x58] sm:$0xff]  ;;  %v472_v53 = vld [vmem:[%s2927_s4 + $0x140] sm:$0xff]  ;;  %v474_v54 = vld [vmem:[%s2927_s4 + $0x150] sm:$0xff]  ;;  %v500_v57 = vpack.c.bf16 %v442_v50, %v440_v49 }
  0x51   : > { %v473_v55 = vld [vmem:[%s2927_s4 + $0x148] sm:$0xff]  ;;  %v475_v56 = vld [vmem:[%s2927_s4 + $0x158] sm:$0xff]  ;;  %v501_v58 = vpack.c.bf16 %v443_v52, %v441_v51  ;;  %v516_v59 = vpack.c.bf16 %v474_v54, %v472_v53  ;;  %v2117_v61 = vld [vmem:[#allocation7 + $0x44] sm:$0xf] }
  0x52   : > { %v517_v60 = vpack.c.bf16 %v475_v56, %v473_v55  ;;  %v1990_v62 = vld [vmem:[#allocation7 + $0x48] sm:$0xf0]  ;;  %v444_v0 = vld [vmem:[%s2927_s4 + $0x60] sm:$0xff]  ;;  %v446_v1 = vld [vmem:[%s2927_s4 + $0x70] sm:$0xff] }
  0x53   : > { %664 = vmatpush.bf16.msra.mxu0 %v2096_v8  ;;  %2243 = vmatpush.bf16.msra.mxu2 %v2096_v8  ;;  %v1993_v63 = vor.u32 %v2117_v61, %v1990_v62  ;;  %v445_v2 = vld [vmem:[%s2927_s4 + $0x68] sm:$0xff]  ;;  %v447_v3 = vld [vmem:[%s2927_s4 + $0x78] sm:$0xff]  ;;  %v476_v4 = vld [vmem:[%s2927_s4 + $0x160] sm:$0xff]  ;;  %v502_v8 = vpack.c.bf16 %v446_v1, %v444_v0 }
  0x54   : > { %753 = vmatpush.bf16.msra.mxu1 %v2104_v9  ;;  %2251 = vmatpush.bf16.msra.mxu3 %v2104_v9  ;;  %v478_v5 = vld [vmem:[%s2927_s4 + $0x170] sm:$0xff]  ;;  %v477_v6 = vld [vmem:[%s2927_s4 + $0x168] sm:$0xff]  ;;  %v479_v7 = vld [vmem:[%s2927_s4 + $0x178] sm:$0xff]  ;;  %v503_v9 = vpack.c.bf16 %v447_v3, %v445_v2 }
  0x55   : > { %v450_v16 = vld [vmem:[%s2927_s4 + $0x90] sm:$0xff]  ;;  %v449_v17 = vld [vmem:[%s2927_s4 + $0x88] sm:$0xff]  ;;  %v451_v18 = vld [vmem:[%s2927_s4 + $0x98] sm:$0xff] }
  0x56   : > { %v480_v19 = vld [vmem:[%s2927_s4 + $0x180] sm:$0xff]  ;;  %v482_v20 = vld [vmem:[%s2927_s4 + $0x190] sm:$0xff]  ;;  %v481_v21 = vld [vmem:[%s2927_s4 + $0x188] sm:$0xff]  ;;  %v505_v24 = vpack.c.bf16 %v451_v18, %v449_v17 }
  0x57   : > { %665 = vmatpush.bf16.msra.mxu0 %v2095_v10  ;;  %2244 = vmatpush.bf16.msra.mxu2 %v2095_v10  ;;  %v518_v10 = vpack.c.bf16 %v478_v5, %v476_v4  ;;  %v483_v22 = vld [vmem:[%s2927_s4 + $0x198] sm:$0xff]  ;;  %v520_v25 = vpack.c.bf16 %v482_v20, %v480_v19  ;;  %v454_v31 = vld [vmem:[%s2927_s4 + $0xb0] sm:$0xff]  ;;  %v453_v32 = vld [vmem:[%s2927_s4 + $0xa8] sm:$0xff] }
  0x58   : > { %754 = vmatpush.bf16.msra.mxu1 %v2103_v11  ;;  %2252 = vmatpush.bf16.msra.mxu3 %v2103_v11  ;;  %v519_v11 = vpack.c.bf16 %v479_v7, %v477_v6  ;;  %v484_v34 = vld [vmem:[%s2927_s4 + $0x1a0] sm:$0xff]  ;;  %v486_v35 = vld [vmem:[%s2927_s4 + $0x1b0] sm:$0xff]  ;;  %v485_v36 = vld [vmem:[%s2927_s4 + $0x1a8] sm:$0xff] }
  0x59   : > { %v487_v37 = vld [vmem:[%s2927_s4 + $0x1b8] sm:$0xff]  ;;  %v522_v40 = vpack.c.bf16 %v486_v35, %v484_v34  ;;  %v2004_v47 = vld [vmem:[#allocation7 + $0x60] sm:$0xf]  ;;  %v1996_v51 = vld [vmem:[#allocation7 + $0x50] sm:$0xf] }
  0x5a   : > { %v523_v41 = vpack.c.bf16 %v487_v37, %v485_v36  ;;  %v2124_v46 = vld [vmem:[#allocation7 + $0x74] sm:$0xf0]  ;;  %v456_v53 = vld [vmem:[%s2927_s4 + $0xc0] sm:$0xff]  ;;  %v458_v54 = vld [vmem:[%s2927_s4 + $0xd0] sm:$0xff] }
  0x5b   : > { %666 = vmatpush.bf16.msra.mxu0 %v2094_v12  ;;  %2245 = vmatpush.bf16.msra.mxu2 %v2094_v12  ;;  %v2115_v12 = vld [vmem:[#allocation7 + $0x34] sm:$0xf]  ;;  %v2120_v52 = vld [vmem:[#allocation7 + $0x54] sm:$0xf0]  ;;  %v457_v56 = vld [vmem:[%s2927_s4 + $0xc8] sm:$0xff]  ;;  %v508_v62 = vpack.c.bf16 %v458_v54, %v456_v53 }
  0x5c   : > { %755 = vmatpush.bf16.msra.mxu1 %v2102_v13  ;;  %2253 = vmatpush.bf16.msra.mxu3 %v2102_v13  ;;  %v1982_v13 = vld [vmem:[#allocation7 + $0x38] sm:$0xf0]  ;;  %v1997_v55 = vor.u32 %v2120_v52, %v1996_v51  ;;  %v1988_v2 = vld [vmem:[#allocation7 + $0x40] sm:$0xf]  ;;  %v2118_v3 = vld [vmem:[#allocation7 + $0x44] sm:$0xf0] }
  0x5d   : > { %v491_v61 = vld [vmem:[%s2927_s4 + $0x1d8] sm:$0xff]  ;;  %v1989_v4 = vor.u32 %v2118_v3, %v1988_v2  ;;  %v1980_v5 = vld [vmem:[#allocation7 + $0x30] sm:$0xf]  ;;  %v2109_v7 = vld [vmem:[#allocation7 + $0x4] sm:$0xf] }
  0x5e   : > { %v2116_v6 = vld [vmem:[#allocation7 + $0x34] sm:$0xf0]  ;;  %v492_v18 = vld [vmem:[%s2927_s4 + $0x1e0] sm:$0xff]  ;;  %v1964_v19 = vld [vmem:[#allocation7 + $0x10] sm:$0xf] }
  0x5f   : > { %667 = vmatpush.bf16.msra.mxu0 %v2093_v14  ;;  %2246 = vmatpush.bf16.msra.mxu2 %v2093_v14  ;;  %v1985_v14 = vor.u32 %v2115_v12, %v1982_v13  ;;  %v2114_v12 = vld [vmem:[#allocation7 + $0x24] sm:$0xf0]  ;;  %v463_v17 = vld [vmem:[%s2927_s4 + $0xf8] sm:$0xff] }
  0x60   : > { %756 = vmatpush.bf16.msra.mxu1 %v2101_v15  ;;  %2254 = vmatpush.bf16.msra.mxu3 %v2101_v15  ;;  %v448_v15 = vld [vmem:[%s2927_s4 + $0x80] sm:$0xff]  ;;  %v2112_v20 = vld [vmem:[#allocation7 + $0x14] sm:$0xf0] }
  0x61   : > { %v504_v23 = vpack.c.bf16 %v450_v16, %v448_v15  ;;  %v462_v15 = vld [vmem:[%s2927_s4 + $0xf0] sm:$0xff]  ;;  %v461_v16 = vld [vmem:[%s2927_s4 + $0xe8] sm:$0xff] }
  0x62   : > { %668 = vmatmul.bf16.vlgmr.msra.gmra.mxu0 %v496_v27  ;;  %708 = vmatmul.bf16.vlgmr.msra.gmra.mxu2 %v512_v29  ;;  %v2113_v27 = vld [vmem:[#allocation7 + $0x24] sm:$0xf] }
  0x63   : > { %757 = vmatmul.bf16.vlgmr.msra.gmra.mxu1 %v497_v28  ;;  %797 = vmatmul.bf16.vlgmr.msra.gmra.mxu3 %v513_v30  ;;  %v1974_v28 = vld [vmem:[#allocation7 + $0x28] sm:$0xf0]  ;;  %v452_v30 = vld [vmem:[%s2927_s4 + $0xa0] sm:$0xff] }
  0x64   : > { %1071 = vmatpush.bf16.msrb.mxu3 %v2017_v26  ;;  %v521_v26 = vpack.c.bf16 %v483_v22, %v481_v21  ;;  %v1977_v29 = vor.u32 %v2113_v27, %v1974_v28  ;;  %v506_v38 = vpack.c.bf16 %v454_v31, %v452_v30  ;;  %v494_v21 = vld [vmem:[%s2927_s4 + $0x1f0] sm:$0xff]  ;;  %v493_v22 = vld [vmem:[%s2927_s4 + $0x1e8] sm:$0xff] }
  0x65   : > { %v526_v27 = vpack.c.bf16 %v494_v21, %v492_v18  ;;  %v2110_v30 = vld [vmem:[#allocation7 + $0x4] sm:$0xf0] }
  0x68   : > { %1072 = vmatpush.bf16.msrb.mxu3 %v2009_v33  ;;  %v455_v33 = vld [vmem:[%s2927_s4 + $0xb8] sm:$0xff] }
  0x69   : > { %v507_v39 = vpack.c.bf16 %v455_v33, %v453_v32  ;;  %v3008_v32 = vld [vmem:[%s3361_s2] ss:$0 sm:$0xff] }
  0x6c   : > { %1073 = vmatpush.bf16.msrb.mxu3 %v2001_v48  ;;  %v2122_v48 = vld [vmem:[#allocation7 + $0x64] sm:$0xf0] }
  0x6d   : > { %v2005_v50 = vor.u32 %v2122_v48, %v2004_v47  ;;  %v2139_v47 = vld [vmem:[#allocation10 + $0x74] sm:$0xf] }
  0x70   : > { %1074 = vmatpush.bf16.msrb.mxu3 %v1993_v63 }
  0x72   : > { %673 = vmatmul.bf16.gmra.mxu0 %v498_v42  ;;  %713 = vmatmul.bf16.gmra.mxu2 %v514_v44  ;;  %v2111_v42 = vld [vmem:[#allocation7 + $0x14] sm:$0xf]  ;;  %v2012_v44 = vld [vmem:[#allocation7 + $0x70] sm:$0xf] }
  0x73   : > { %762 = vmatmul.bf16.gmra.mxu1 %v499_v43  ;;  %802 = vmatmul.bf16.gmra.mxu3 %v515_v45  ;;  %v1966_v43 = vld [vmem:[#allocation7 + $0x18] sm:$0xf0]  ;;  %v2013_v49 = vor.u32 %v2124_v46, %v2012_v44 }
  0x74   : > { %1075 = vmatpush.bf16.msrb.mxu3 %v1985_v14  ;;  %v1969_v45 = vor.u32 %v2111_v42, %v1966_v43  ;;  %v460_v14 = vld [vmem:[%s2927_s4 + $0xe0] sm:$0xff]  ;;  %v2140_v46 = vld [vmem:[#allocation10 + $0x74] sm:$0xf0] }
  0x75   : > { %982 = vmatpush.bf16.msrb.mxu2 %v2013_v49  ;;  %v2078_v49 = vld [vmem:[#allocation10 + $0x78] sm:$0xf0] }
  0x76   : > { %v2081_v52 = vor.u32 %v2139_v47, %v2078_v49 }
  0x78   : > { %1076 = vmatpush.bf16.msrb.mxu3 %v1977_v29  ;;  %v1956_v29 = vld [vmem:[#allocation7] sm:$0xf]  ;;  %1471 = vmatpush.bf16.msrb.mxu1 %v2081_v52 }
  0x79   : > { %983 = vmatpush.bf16.msrb.mxu2 %v2005_v50  ;;  %v1957_v31 = vor.u32 %v2110_v30, %v1956_v29  ;;  %v2135_v29 = vld [vmem:[#allocation10 + $0x54] sm:$0xf] }
  0x7c   : > { %1077 = vmatpush.bf16.msrb.mxu3 %v1969_v45  ;;  %v2076_v45 = vld [vmem:[#allocation10 + $0x70] sm:$0xf] }
  0x7d   : > { %984 = vmatpush.bf16.msrb.mxu2 %v1997_v55  ;;  %v2077_v48 = vor.u32 %v2140_v46, %v2076_v45 }
  0x7f   : > { %1382 = vmatpush.bf16.msrb.mxu0 %v2077_v48 }
  0x81   : > { %985 = vmatpush.bf16.msrb.mxu2 %v1989_v4  ;;  %v2068_v4 = vld [vmem:[#allocation10 + $0x60] sm:$0xf] }
  0x82   : > { %678 = vmatmul.bf16.gmra.mxu0 %v500_v57  ;;  %718 = vmatmul.bf16.gmra.mxu2 %v516_v59  ;;  %v459_v57 = vld [vmem:[%s2927_s4 + $0xd8] sm:$0xff]  ;;  %v490_v59 = vld [vmem:[%s2927_s4 + $0x1d0] sm:$0xff] }
  0x83   : > { %767 = vmatmul.bf16.gmra.mxu1 %v501_v58  ;;  %807 = vmatmul.bf16.gmra.mxu3 %v517_v60  ;;  %v488_v58 = vld [vmem:[%s2927_s4 + $0x1c0] sm:$0xff]  ;;  %v489_v60 = vld [vmem:[%s2927_s4 + $0x1c8] sm:$0xff]  ;;  %v509_v63 = vpack.c.bf16 %v459_v57, %v457_v56 }
  0x84   : > { %v524_v0 = vpack.c.bf16 %v490_v59, %v488_v58  ;;  %v525_v1 = vpack.c.bf16 %v491_v61, %v489_v60 }
  0x92   : > { %683 = vmatmul.bf16.gmra.mxu0 %v502_v8  ;;  %723 = vmatmul.bf16.gmra.mxu2 %v518_v10  ;;  %v1958_v8 = vld [vmem:[#allocation7 + $0x8] sm:$0xf0] }
  0x93   : > { %772 = vmatmul.bf16.gmra.mxu1 %v503_v9  ;;  %812 = vmatmul.bf16.gmra.mxu3 %v519_v11  ;;  %v1981_v9 = vor.u32 %v2116_v6, %v1980_v5  ;;  %v1961_v10 = vor.u32 %v2109_v7, %v1958_v8  ;;  %v1972_v11 = vld [vmem:[#allocation7 + $0x20] sm:$0xf]  ;;  %v2138_v5 = vld [vmem:[#allocation10 + $0x64] sm:$0xf0]  ;;  %v2137_v6 = vld [vmem:[#allocation10 + $0x64] sm:$0xf] }
  0x94   : > { %v1973_v13 = vor.u32 %v2114_v12, %v1972_v11  ;;  %v2069_v7 = vor.u32 %v2138_v5, %v2068_v4  ;;  %v2070_v8 = vld [vmem:[#allocation10 + $0x68] sm:$0xf0] }
  0x95   : > { %1078 = vmatpush.bf16.msrb.mxu3 %v1961_v10  ;;  %986 = vmatpush.bf16.msrb.mxu2 %v1981_v9  ;;  %v2073_v11 = vor.u32 %v2137_v6, %v2070_v8 }
  0x96   : > { %1383 = vmatpush.bf16.msrb.mxu0 %v2069_v7 }
  0x97   : > { %1472 = vmatpush.bf16.msrb.mxu1 %v2073_v11 }
  0x99   : > { %987 = vmatpush.bf16.msrb.mxu2 %v1973_v13 }
  0xa2   : > { %688 = vmatmul.bf16.gmra.mxu0 %v504_v23  ;;  %728 = vmatmul.bf16.gmra.mxu2 %v520_v25  ;;  %v495_v23 = vld [vmem:[%s2927_s4 + $0x1f8] sm:$0xff]  ;;  %v510_v25 = vpack.c.bf16 %v462_v15, %v460_v14  ;;  %s1705_s4 = scalar_lea.hbm %s3367_s8, %s2141_s26 }
  0xa3   : > { %777 = vmatmul.bf16.gmra.mxu1 %v505_v24  ;;  %817 = vmatmul.bf16.gmra.mxu3 %v521_v26  ;;  %v1965_v24 = vor.u32 %v2112_v20, %v1964_v19  ;;  %v511_v26 = vpack.c.bf16 %v463_v17, %v461_v16  ;;  %v527_v28 = vpack.c.bf16 %v495_v23, %v493_v22  ;;  %s1708_s15 = sshll.u32 %s1705_s4, 4  ;;  %s1709_s15 = int_to_ptr.hbm [resolvable:$true] %s1708_s15 }
  0xa4   : > { %s2652_s14 = sshra.s32 %s1709_s15, 4  ;;  %s2653_s14 = int_to_ptr.hbm [resolvable:$true] %s2652_s14 }
  0xa5   : > { %988 = vmatpush.bf16.msrb.mxu2 %v1965_v24  ;;  %s2654_s24 = scalar_lea.hbm %s2653_s14, 128  ;;  %p2659_p2 = scmp.lt.s32.totalorder %s2653_s14, %s3367_s8 }
  0xa6   : > { %p2655_p1 = scmp.ne.s32.totalorder %s2653_s14, %s2654_s24  ;;  %p2660_p7 = scmp.lt.s32.totalorder %s2658_s29, %s2654_s24 }
  0xa8   : > { %p2656_p4 = pnand %p2655_p1, %p2893_p0  ;;  %p2661_p9 = por %p2660_p7, %p2659_p2 }
  0xa9   : > { %989 = vmatpush.bf16.msrb.mxu2 %v1957_v31  ;;  %v2062_v31 = vld [vmem:[#allocation10 + $0x58] sm:$0xf0] }
  0xaa   : > { %p2657_p8 = pneg %p2656_p4 }
  0xac   : > { %p2662_p10 = pnand %p2661_p9, %p2657_p8 }
  0xb2   : > { %693 = vmatmul.bf16.gmra.mxu0 %v506_v38  ;;  %733 = vmatmul.bf16.gmra.mxu2 %v522_v40 }
  0xb3   : > { %782 = vmatmul.bf16.gmra.mxu1 %v507_v39  ;;  %822 = vmatmul.bf16.gmra.mxu3 %v523_v41 }
  0xc2   : > { %698 = vmatmul.bf16.gmra.mxu0 %v508_v62  ;;  %738 = vmatmul.bf16.gmra.mxu2 %v524_v0 }
  0xc3   : > { %787 = vmatmul.bf16.gmra.mxu1 %v509_v63  ;;  %827 = vmatmul.bf16.gmra.mxu3 %v525_v1 }
  0xd2   : > { %703 = vmatmul.bf16.gmra.mxu0 %v510_v25  ;;  %743 = vmatmul.bf16.gmra.mxu2 %v526_v27  ;;  %v2060_v27 = vld [vmem:[#allocation10 + $0x50] sm:$0xf] }
  0xd3   : > { %792 = vmatmul.bf16.gmra.mxu1 %v511_v26  ;;  %832 = vmatmul.bf16.gmra.mxu3 %v527_v28  ;;  %v2136_v28 = vld [vmem:[#allocation10 + $0x54] sm:$0xf0] }
  0xd4   : > { %v2061_v30 = vor.u32 %v2136_v28, %v2060_v27 }
  0xd6   : > { %1384 = vmatpush.bf16.msrb.mxu0 %v2061_v30 }
  0xdf   : > { %v669_v33 = vpop.f32.mrf.mxu0 }
  0xe0   : > { %v758_v34 = vpop.f32.mrf.mxu1  ;;  %v670_v35 = vadd.f32 %v3008_v32, %v669_v33 }
  0xe2   : > { %v759_v38 = vadd.f32 %v758_v34, %v670_v35  ;;  %v2065_v35 = vor.u32 %v2135_v29, %v2062_v31 }
  0xe4   : > { %2360 = vtanh.f32 %v759_v38  ;;  %1473 = vmatpush.bf16.msrb.mxu1 %v2065_v35 }
  0xe5   : > { %v709_v36 = vpop.f32.mrf.mxu2 }
  0xe6   : > { %v798_v37 = vpop.f32.mrf.mxu3  ;;  %v710_v41 = vadd.f32 %v3008_v32, %v709_v36 }
  0xe7   : > { %v671_v39 = vpop.f32.mrf.mxu0 }
  0xe8   : > { %v760_v40 = vpop.f32.mrf.mxu1  ;;  %v672_v42 = vadd.f32 %v3008_v32, %v671_v39  ;;  %v3013_v43 = vadd.f32 %v798_v37, %v710_v41 }
  0xea   : > { %v761_v44 = vadd.f32 %v760_v40, %v672_v42  ;;  %v2361_v55 = vpop.eup %2360 }
  0xec   : > { %2362 = vtanh.f32 %v761_v44 }
  0xed   : > { %v3015_v50 = vpop.f32.mrf.mxu2 }
  0xee   : > { %v3017_v51 = vpop.f32.mrf.mxu3 }
  0xef   : > { %v674_v53 = vpop.f32.mrf.mxu0 }
  0xf0   : > { %v763_v54 = vpop.f32.mrf.mxu1  ;;  %v675_v57 = vadd.f32 %v3008_v32, %v674_v53 }
  0xf2   : > { %v2363_v56 = vpop.eup %2362  ;;  %v764_v61 = vadd.f32 %v763_v54, %v675_v57  ;;  %v2052_v54 = vld [vmem:[#allocation10 + $0x40] sm:$0xf] }
  0xf3   : > { %v870_v58 = vpack.c.bf16 %v2363_v56, %v2361_v55  ;;  %v2134_v55 = vld [vmem:[#allocation10 + $0x44] sm:$0xf0]  ;;  %v2133_v56 = vld [vmem:[#allocation10 + $0x44] sm:$0xf] }
  0xf4   : > { %2364 = vtanh.f32 %v764_v61  ;;  %v2053_v57 = vor.u32 %v2134_v55, %v2052_v54 }
  0xf5   : > { %990 = vmatmul.bf16.vlgmr.msrb.gmra.mxu2 %v870_v58  ;;  %1079 = vmatmul.bf16.vlgmr.msrb.gmra.mxu3 %v870_v58  ;;  %v714_v59 = vpop.f32.mrf.mxu2  ;;  %v2054_v58 = vld [vmem:[#allocation10 + $0x48] sm:$0xf0] }
  0xf6   : > { %v803_v60 = vpop.f32.mrf.mxu3  ;;  %v715_v0 = vadd.f32 %v3008_v32, %v714_v59  ;;  %v2057_v61 = vor.u32 %v2133_v56, %v2054_v58  ;;  %1385 = vmatpush.bf16.msrb.mxu0 %v2053_v57 }
  0xf7   : > { %v676_v62 = vpop.f32.mrf.mxu0 }
  0xf8   : > { %v765_v63 = vpop.f32.mrf.mxu1  ;;  %v677_v1 = vadd.f32 %v3008_v32, %v676_v62  ;;  %v3022_v2 = vadd.f32 %v803_v60, %v715_v0  ;;  %1474 = vmatpush.bf16.msrb.mxu1 %v2057_v61 }
  0xfa   : > { %v766_v3 = vadd.f32 %v765_v63, %v677_v1  ;;  %v2365_v14 = vpop.eup %2364 }
  0xfc   : > { %2366 = vtanh.f32 %v766_v3 }
  0xfd   : > { %v3024_v9 = vpop.f32.mrf.mxu2 }
  0xfe   : > { %v3026_v10 = vpop.f32.mrf.mxu3 }
  0xff   : > { %v679_v12 = vpop.f32.mrf.mxu0 }
 0x100   : > { %v768_v13 = vpop.f32.mrf.mxu1  ;;  %v680_v16 = vadd.f32 %v3008_v32, %v679_v12 }
 0x102   : > { %v2367_v15 = vpop.eup %2366  ;;  %v769_v20 = vadd.f32 %v768_v13, %v680_v16  ;;  %v2044_v16 = vld [vmem:[#allocation10 + $0x30] sm:$0xf] }
 0x103   : > { %v871_v17 = vpack.c.bf16 %v2367_v15, %v2365_v14 }
 0x104   : > { %2368 = vtanh.f32 %v769_v20  ;;  %v2046_v20 = vld [vmem:[#allocation10 + $0x38] sm:$0xf0] }
 0x105   : > { %995 = vmatmul.bf16.gmra.mxu2 %v871_v17  ;;  %1084 = vmatmul.bf16.gmra.mxu3 %v871_v17  ;;  %v719_v18 = vpop.f32.mrf.mxu2  ;;  %v2132_v17 = vld [vmem:[#allocation10 + $0x34] sm:$0xf0] }
 0x106   : > { %v808_v19 = vpop.f32.mrf.mxu3  ;;  %v720_v23 = vadd.f32 %v3008_v32, %v719_v18  ;;  %v2131_v18 = vld [vmem:[#allocation10 + $0x34] sm:$0xf] }
 0x107   : > { %v681_v21 = vpop.f32.mrf.mxu0 }
 0x108   : > { %v770_v22 = vpop.f32.mrf.mxu1  ;;  %v682_v24 = vadd.f32 %v3008_v32, %v681_v21  ;;  %v3031_v25 = vadd.f32 %v808_v19, %v720_v23  ;;  %v2045_v19 = vor.u32 %v2132_v17, %v2044_v16  ;;  %v2049_v23 = vor.u32 %v2131_v18, %v2046_v20 }
 0x10a   : > { %v771_v26 = vadd.f32 %v770_v22, %v682_v24  ;;  %v2369_v38 = vpop.eup %2368  ;;  %1386 = vmatpush.bf16.msrb.mxu0 %v2045_v19  ;;  %1475 = vmatpush.bf16.msrb.mxu1 %v2049_v23 }
 0x10c   : > { %2370 = vtanh.f32 %v771_v26 }
 0x10d   : > { %v3033_v33 = vpop.f32.mrf.mxu2 }
 0x10e   : > { %v3035_v34 = vpop.f32.mrf.mxu3 }
 0x10f   : > { %v684_v36 = vpop.f32.mrf.mxu0 }
 0x110   : > { %v773_v37 = vpop.f32.mrf.mxu1  ;;  %v685_v40 = vadd.f32 %v3008_v32, %v684_v36 }
 0x112   : > { %v2371_v39 = vpop.eup %2370  ;;  %v774_v45 = vadd.f32 %v773_v37, %v685_v40 }
 0x113   : > { %v872_v41 = vpack.c.bf16 %v2371_v39, %v2369_v38 }
 0x114   : > { %2372 = vtanh.f32 %v774_v45  ;;  %v2130_v45 = vld [vmem:[#allocation10 + $0x24] sm:$0xf0] }
 0x115   : > { %1000 = vmatmul.bf16.gmra.mxu2 %v872_v41  ;;  %1089 = vmatmul.bf16.gmra.mxu3 %v872_v41  ;;  %v724_v42 = vpop.f32.mrf.mxu2 }
 0x116   : > { %v813_v44 = vpop.f32.mrf.mxu3  ;;  %v725_v48 = vadd.f32 %v3008_v32, %v724_v42 }
 0x117   : > { %v686_v46 = vpop.f32.mrf.mxu0 }
 0x118   : > { %v775_v47 = vpop.f32.mrf.mxu1  ;;  %v687_v49 = vadd.f32 %v3008_v32, %v686_v46  ;;  %v3040_v52 = vadd.f32 %v813_v44, %v725_v48  ;;  %v2036_v44 = vld [vmem:[#allocation10 + $0x20] sm:$0xf]  ;;  %v2129_v46 = vld [vmem:[#allocation10 + $0x24] sm:$0xf]  ;;  %v2038_v48 = vld [vmem:[#allocation10 + $0x28] sm:$0xf0] }
 0x119   : > { %v2041_v54 = vor.u32 %v2129_v46, %v2038_v48 }
 0x11a   : > { %v776_v53 = vadd.f32 %v775_v47, %v687_v49  ;;  %v2373_v0 = vpop.eup %2372  ;;  %v2037_v47 = vor.u32 %v2130_v45, %v2036_v44  ;;  %v2126_v44 = vld [vmem:[#allocation10 + $0x4] sm:$0xf0]  ;;  %v2125_v45 = vld [vmem:[#allocation10 + $0x4] sm:$0xf] }
 0x11b   : > { %1476 = vmatpush.bf16.msrb.mxu1 %v2041_v54 }
 0x11c   : > { %2374 = vtanh.f32 %v776_v53  ;;  %1387 = vmatpush.bf16.msrb.mxu0 %v2037_v47  ;;  %v2022_v47 = vld [vmem:[#allocation10 + $0x8] sm:$0xf0] }
 0x11d   : > { %v3042_v59 = vpop.f32.mrf.mxu2  ;;  %v2025_v48 = vor.u32 %v2125_v45, %v2022_v47 }
 0x11e   : > { %v3044_v60 = vpop.f32.mrf.mxu3 }
 0x11f   : > { %v689_v62 = vpop.f32.mrf.mxu0 }
 0x120   : > { %v778_v63 = vpop.f32.mrf.mxu1  ;;  %v690_v3 = vadd.f32 %v3008_v32, %v689_v62 }
 0x122   : > { %v2375_v1 = vpop.eup %2374  ;;  %v779_v7 = vadd.f32 %v778_v63, %v690_v3  ;;  %v2028_v63 = vld [vmem:[#allocation10 + $0x10] sm:$0xf] }
 0x123   : > { %v873_v4 = vpack.c.bf16 %v2375_v1, %v2373_v0  ;;  %v2128_v0 = vld [vmem:[#allocation10 + $0x14] sm:$0xf0]  ;;  %v2127_v1 = vld [vmem:[#allocation10 + $0x14] sm:$0xf] }
 0x124   : > { %2376 = vtanh.f32 %v779_v7 }
 0x125   : > { %1005 = vmatmul.bf16.gmra.mxu2 %v873_v4  ;;  %1094 = vmatmul.bf16.gmra.mxu3 %v873_v4  ;;  %v729_v5 = vpop.f32.mrf.mxu2 }
 0x126   : > { %v818_v6 = vpop.f32.mrf.mxu3  ;;  %v730_v12 = vadd.f32 %v3008_v32, %v729_v5  ;;  %v2029_v5 = vor.u32 %v2128_v0, %v2028_v63 }
 0x127   : > { %v691_v8 = vpop.f32.mrf.mxu0 }
 0x128   : > { %v780_v11 = vpop.f32.mrf.mxu1  ;;  %v692_v13 = vadd.f32 %v3008_v32, %v691_v8  ;;  %v3049_v14 = vadd.f32 %v818_v6, %v730_v12  ;;  %v2030_v6 = vld [vmem:[#allocation10 + $0x18] sm:$0xf0]  ;;  %1388 = vmatpush.bf16.msrb.mxu0 %v2029_v5 }
 0x129   : > { %v3095_v5 = vld [vmem:[#allocation8] ss:$0 sm:$0xff] }
 0x12a   : > { %v781_v15 = vadd.f32 %v780_v11, %v692_v13  ;;  %v2377_v27 = vpop.eup %2376  ;;  %v2033_v13 = vor.u32 %v2127_v1, %v2030_v6  ;;  %v717_v1 = vadd.f32 %v3008_v32, %v3024_v9 }
 0x12c   : > { %2378 = vtanh.f32 %v781_v15  ;;  %1477 = vmatpush.bf16.msrb.mxu1 %v2033_v13  ;;  %v722_v13 = vadd.f32 %v3008_v32, %v3033_v33 }
 0x12d   : > { %v3051_v21 = vpop.f32.mrf.mxu2 }
 0x12e   : > { %v3053_v22 = vpop.f32.mrf.mxu3 }
 0x12f   : > { %v694_v24 = vpop.f32.mrf.mxu0 }
 0x130   : > { %v783_v26 = vpop.f32.mrf.mxu1  ;;  %v695_v29 = vadd.f32 %v3008_v32, %v694_v24  ;;  %1478 = vmatpush.bf16.msrb.mxu1 %v2025_v48 }
 0x132   : > { %v2379_v28 = vpop.eup %2378  ;;  %v784_v36 = vadd.f32 %v783_v26, %v695_v29 }
 0x133   : > { %v874_v30 = vpack.c.bf16 %v2379_v28, %v2377_v27 }
 0x134   : > { %2380 = vtanh.f32 %v784_v36 }
 0x135   : > { %1010 = vmatmul.bf16.gmra.mxu2 %v874_v30  ;;  %1099 = vmatmul.bf16.gmra.mxu3 %v874_v30  ;;  %v734_v31 = vpop.f32.mrf.mxu2 }
 0x136   : > { %v823_v35 = vpop.f32.mrf.mxu3  ;;  %v735_v39 = vadd.f32 %v3008_v32, %v734_v31 }
 0x137   : > { %v696_v37 = vpop.f32.mrf.mxu0 }
 0x138   : > { %v785_v38 = vpop.f32.mrf.mxu1  ;;  %v697_v40 = vadd.f32 %v3008_v32, %v696_v37  ;;  %v3058_v41 = vadd.f32 %v823_v35, %v735_v39 }
 0x13a   : > { %v786_v42 = vadd.f32 %v785_v38, %v697_v40  ;;  %v2381_v57 = vpop.eup %2380 }
 0x13c   : > { %2382 = vtanh.f32 %v786_v42  ;;  %v2020_v42 = vld [vmem:[#allocation10] sm:$0xf] }
 0x13d   : > { %v3060_v49 = vpop.f32.mrf.mxu2  ;;  %v2021_v46 = vor.u32 %v2126_v44, %v2020_v42 }
 0x13e   : > { %v3062_v53 = vpop.f32.mrf.mxu3 }
 0x13f   : > { %v699_v55 = vpop.f32.mrf.mxu0  ;;  %1389 = vmatpush.bf16.msrb.mxu0 %v2021_v46 }
 0x140   : > { %v788_v56 = vpop.f32.mrf.mxu1  ;;  %v700_v61 = vadd.f32 %v3008_v32, %v699_v55 }
 0x142   : > { %v2383_v58 = vpop.eup %2382  ;;  %v789_v7 = vadd.f32 %v788_v56, %v700_v61  ;;  %v712_v56 = vadd.f32 %v3008_v32, %v3015_v50  ;;  %v806_v50 = vadd.f32 %v3026_v10, %v717_v1 }
 0x143   : > { %v875_v62 = vpack.c.bf16 %v2383_v58, %v2381_v57 }
 0x144   : > { %2384 = vtanh.f32 %v789_v7  ;;  %v801_v58 = vadd.f32 %v3017_v51, %v712_v56 }
 0x145   : > { %1015 = vmatmul.bf16.gmra.mxu2 %v875_v62  ;;  %1104 = vmatmul.bf16.gmra.mxu3 %v875_v62  ;;  %v739_v3 = vpop.f32.mrf.mxu2 }
 0x146   : > { %v828_v4 = vpop.f32.mrf.mxu3  ;;  %v740_v12 = vadd.f32 %v3008_v32, %v739_v3 }
 0x147   : > { %v701_v8 = vpop.f32.mrf.mxu0 }
 0x148   : > { %v790_v11 = vpop.f32.mrf.mxu1  ;;  %v702_v15 = vadd.f32 %v3008_v32, %v701_v8  ;;  %v3067_v16 = vadd.f32 %v828_v4, %v740_v12 }
 0x14a   : > { %v791_v17 = vadd.f32 %v790_v11, %v702_v15  ;;  %v2385_v24 = vpop.eup %2384 }
 0x14c   : > { %2386 = vtanh.f32 %v791_v17 }
 0x14d   : > { %v3069_v18 = vpop.f32.mrf.mxu2 }
 0x14e   : > { %v3071_v19 = vpop.f32.mrf.mxu3 }
 0x14f   : > { %v704_v20 = vpop.f32.mrf.mxu0 }
 0x150   : > { %v793_v23 = vpop.f32.mrf.mxu1  ;;  %v705_v27 = vadd.f32 %v3008_v32, %v704_v20  ;;  %v811_v20 = vadd.f32 %v3035_v34, %v722_v13 }
 0x152   : > { %v2387_v26 = vpop.eup %2386  ;;  %v794_v30 = vadd.f32 %v793_v23, %v705_v27 }
 0x153   : > { %v876_v28 = vpack.c.bf16 %v2387_v26, %v2385_v24 }
 0x154   : > { %2388 = vtanh.f32 %v794_v30 }
 0x155   : > { %1020 = vmatmul.bf16.gmra.mxu2 %v876_v28  ;;  %1109 = vmatmul.bf16.gmra.mxu3 %v876_v28  ;;  %v744_v29 = vpop.f32.mrf.mxu2 }
 0x156   : > { %v745_v35 = vadd.f32 %v3008_v32, %v744_v29  ;;  %v833_v37 = vpop.f32.mrf.mxu3 }
 0x157   : > { %v706_v31 = vpop.f32.mrf.mxu0 }
 0x158   : > { %v707_v36 = vadd.f32 %v3008_v32, %v706_v31  ;;  %v795_v38 = vpop.f32.mrf.mxu1  ;;  %v3076_v39 = vadd.f32 %v833_v37, %v745_v35 }
 0x15a   : > { %v796_v40 = vadd.f32 %v795_v38, %v707_v36  ;;  %v2389_v54 = vpop.eup %2388 }
 0x15c   : > { %2390 = vtanh.f32 %v796_v40 }
 0x15d   : > { %2392 = vtanh.f32 %v3013_v43  ;;  %v3082_v63 = vpop.f32.mrf.mxu2  ;;  %v3093_v43 = vld [vmem:[%s3364_s5] ss:$0 sm:$0xff] }
 0x15e   : > { %2394 = vtanh.f32 %v801_v58  ;;  %v3084_v0 = vpop.f32.mrf.mxu3 }
 0x15f   : > { %2396 = vtanh.f32 %v3022_v2 }
 0x160   : > { %2398 = vtanh.f32 %v806_v50 }
 0x162   : > { %v2391_v55 = vpop.eup %2390 }
 0x163   : > { %v877_v57 = vpack.c.bf16 %v2391_v55, %v2389_v54  ;;  %v2393_v61 = vpop.eup %2392 }
 0x164   : > { %v2395_v62 = vpop.eup %2394 }
 0x165   : > { %1025 = vmatmul.bf16.gmra.mxu2 %v877_v57  ;;  %1114 = vmatmul.bf16.gmra.mxu3 %v877_v57  ;;  %v878_v3 = vpack.c.bf16 %v2395_v62, %v2393_v61  ;;  %v2397_v9 = vpop.eup %2396 }
 0x166   : > { %v2399_v7 = vpop.eup %2398 }
 0x167   : > { %v879_v17 = vpack.c.bf16 %v2399_v7, %v2397_v9 }
 0x175   : > { %1030 = vmatmul.bf16.gmra.mxu2 %v878_v3  ;;  %1119 = vmatmul.bf16.gmra.mxu3 %v878_v3 }
 0x178   : > { %v991_v4 = vpop.f32.mrf.mxu2  ;;  %v1080_v51 = vpop.f32.mrf.mxu3 }
 0x179   : > { %v1200_v6 = vadd.f32 %v3093_v43, %v1080_v51  ;;  %v1164_v10 = vadd.f32 %v3095_v5, %v991_v4 }
 0x17b   : > { %2400 = vtanh.f32 %v1200_v6 }
 0x180   : > { %v993_v8 = vpop.f32.mrf.mxu2  ;;  %v1082_v11 = vpop.f32.mrf.mxu3 }
 0x181   : > { %v1165_v12 = vadd.f32 %v3095_v5, %v993_v8  ;;  %v1201_v2 = vadd.f32 %v3093_v43, %v1082_v11  ;;  %v2401_v23 = vpop.eup %2400 }
 0x183   : > { %v2147_v15 = vpack.c.bf16 %v1165_v12, %v1164_v10  ;;  %2402 = vtanh.f32 %v1201_v2 }
 0x184   : > { %2404 = vtanh.f32 %v3031_v25  ;;  %v727_v25 = vadd.f32 %v3008_v32, %v3042_v59 }
 0x185   : > { %2148 = vst [vmem:[%s3104_s18] sm:$0xff] %v2147_v15   ;;  %1035 = vmatmul.bf16.gmra.mxu2 %v879_v17  ;;  %1124 = vmatmul.bf16.gmra.mxu3 %v879_v17  ;;  %2406 = vtanh.f32 %v811_v20 }
 0x186   : > { %v816_v42 = vadd.f32 %v3044_v60, %v727_v25 }
 0x188   : > { %v996_v24 = vpop.f32.mrf.mxu2  ;;  %v1085_v26 = vpop.f32.mrf.mxu3 }
 0x189   : > { %v2403_v27 = vpop.eup %2402  ;;  %v1202_v28 = vadd.f32 %v3093_v43, %v1085_v26  ;;  %v1166_v36 = vadd.f32 %v3095_v5, %v996_v24 }
 0x18a   : > { %v1264_v33 = vpack.c.bf16 %v2403_v27, %v2401_v23  ;;  %v2405_v29 = vpop.eup %2404 }
 0x18b   : > { %v2407_v30 = vpop.eup %2406  ;;  %2408 = vtanh.f32 %v1202_v28 }
 0x18c   : > { %1390 = vmatmul.bf16.vlgmr.msrb.gmra.mxu0 %v1264_v33  ;;  %1479 = vmatmul.bf16.vlgmr.msrb.gmra.mxu1 %v1264_v33  ;;  %v880_v40 = vpack.c.bf16 %v2407_v30, %v2405_v29 }
 0x190   : > { %v998_v31 = vpop.f32.mrf.mxu2  ;;  %v1087_v35 = vpop.f32.mrf.mxu3 }
 0x191   : > { %v1167_v34 = vadd.f32 %v3095_v5, %v998_v31  ;;  %v1203_v37 = vadd.f32 %v3093_v43, %v1087_v35  ;;  %v2409_v44 = vpop.eup %2408 }
 0x193   : > { %v2152_v38 = vpack.c.bf16 %v1167_v34, %v1166_v36  ;;  %2410 = vtanh.f32 %v1203_v37 }
 0x194   : > { %2412 = vtanh.f32 %v3040_v52  ;;  %v732_v52 = vadd.f32 %v3008_v32, %v3051_v21 }
 0x195   : > { %2224 = vst [vmem:[%s3104_s18 + $0x8] sm:$0xff] %v2152_v38   ;;  %1040 = vmatmul.bf16.gmra.mxu2 %v880_v40  ;;  %1129 = vmatmul.bf16.gmra.mxu3 %v880_v40  ;;  %2414 = vtanh.f32 %v816_v42 }
 0x196   : > { %v821_v3 = vadd.f32 %v3053_v22, %v732_v52 }
 0x198   : > { %v1001_v45 = vpop.f32.mrf.mxu2  ;;  %v1090_v46 = vpop.f32.mrf.mxu3 }
 0x199   : > { %v2411_v47 = vpop.eup %2410  ;;  %v1204_v59 = vadd.f32 %v3093_v43, %v1090_v46  ;;  %v1168_v58 = vadd.f32 %v3095_v5, %v1001_v45 }
 0x19a   : > { %v1265_v48 = vpack.c.bf16 %v2411_v47, %v2409_v44  ;;  %v2413_v54 = vpop.eup %2412 }
 0x19b   : > { %v2415_v55 = vpop.eup %2414  ;;  %2416 = vtanh.f32 %v1204_v59 }
 0x19c   : > { %1395 = vmatmul.bf16.gmra.mxu0 %v1265_v48  ;;  %1484 = vmatmul.bf16.gmra.mxu1 %v1265_v48  ;;  %v881_v1 = vpack.c.bf16 %v2415_v55, %v2413_v54 }
 0x1a0   : > { %v1003_v56 = vpop.f32.mrf.mxu2  ;;  %v1092_v57 = vpop.f32.mrf.mxu3 }
 0x1a1   : > { %v1169_v60 = vadd.f32 %v3095_v5, %v1003_v56  ;;  %v1205_v61 = vadd.f32 %v3093_v43, %v1092_v57  ;;  %v2417_v50 = vpop.eup %2416 }
 0x1a3   : > { %v2157_v62 = vpack.c.bf16 %v1169_v60, %v1168_v58  ;;  %2418 = vtanh.f32 %v1205_v61 }
 0x1a4   : > { %2420 = vtanh.f32 %v3049_v14  ;;  %v737_v14 = vadd.f32 %v3008_v32, %v3060_v49 }
 0x1a5   : > { %2225 = vst [vmem:[%s3104_s18 + $0x10] sm:$0xff] %v2157_v62   ;;  %1045 = vmatmul.bf16.gmra.mxu2 %v881_v1  ;;  %1134 = vmatmul.bf16.gmra.mxu3 %v881_v1  ;;  %2422 = vtanh.f32 %v821_v3 }
 0x1a6   : > { %v826_v17 = vadd.f32 %v3062_v53, %v737_v14 }
 0x1a8   : > { %v1006_v4 = vpop.f32.mrf.mxu2  ;;  %v1095_v51 = vpop.f32.mrf.mxu3 }
 0x1a9   : > { %v2419_v6 = vpop.eup %2418  ;;  %v1206_v21 = vadd.f32 %v3093_v43, %v1095_v51  ;;  %v1170_v12 = vadd.f32 %v3095_v5, %v1006_v4 }
 0x1aa   : > { %v1266_v9 = vpack.c.bf16 %v2419_v6, %v2417_v50  ;;  %v2421_v7 = vpop.eup %2420 }
 0x1ab   : > { %v2423_v8 = vpop.eup %2422  ;;  %2424 = vtanh.f32 %v1206_v21 }
 0x1ac   : > { %1400 = vmatmul.bf16.gmra.mxu0 %v1266_v9  ;;  %1489 = vmatmul.bf16.gmra.mxu1 %v1266_v9  ;;  %v882_v15 = vpack.c.bf16 %v2423_v8, %v2421_v7 }
 0x1b0   : > { %v1008_v11 = vpop.f32.mrf.mxu2  ;;  %v1097_v10 = vpop.f32.mrf.mxu3 }
 0x1b1   : > { %v1171_v22 = vadd.f32 %v3095_v5, %v1008_v11  ;;  %v1207_v2 = vadd.f32 %v3093_v43, %v1097_v10  ;;  %v2425_v20 = vpop.eup %2424 }
 0x1b3   : > { %v2162_v13 = vpack.c.bf16 %v1171_v22, %v1170_v12  ;;  %2426 = vtanh.f32 %v1207_v2 }
 0x1b4   : > { %2428 = vtanh.f32 %v3058_v41  ;;  %v742_v41 = vadd.f32 %v3008_v32, %v3069_v18 }
 0x1b5   : > { %2226 = vst [vmem:[%s3104_s18 + $0x18] sm:$0xff] %v2162_v13   ;;  %1050 = vmatmul.bf16.gmra.mxu2 %v882_v15  ;;  %1139 = vmatmul.bf16.gmra.mxu3 %v882_v15  ;;  %2430 = vtanh.f32 %v826_v17 }
 0x1b6   : > { %v831_v37 = vadd.f32 %v3071_v19, %v742_v41 }
 0x1b8   : > { %v1011_v23 = vpop.f32.mrf.mxu2  ;;  %v1100_v24 = vpop.f32.mrf.mxu3 }
 0x1b9   : > { %v2427_v26 = vpop.eup %2426  ;;  %v1208_v49 = vadd.f32 %v3093_v43, %v1100_v24  ;;  %v1172_v31 = vadd.f32 %v3095_v5, %v1011_v23 }
 0x1ba   : > { %v1267_v27 = vpack.c.bf16 %v2427_v26, %v2425_v20  ;;  %v2429_v33 = vpop.eup %2428 }
 0x1bb   : > { %v2431_v28 = vpop.eup %2430  ;;  %2432 = vtanh.f32 %v1208_v49 }
 0x1bc   : > { %1405 = vmatmul.bf16.gmra.mxu0 %v1267_v27  ;;  %1494 = vmatmul.bf16.gmra.mxu1 %v1267_v27  ;;  %v883_v34 = vpack.c.bf16 %v2431_v28, %v2429_v33 }
 0x1c0   : > { %v1013_v29 = vpop.f32.mrf.mxu2  ;;  %v1102_v30 = vpop.f32.mrf.mxu3 }
 0x1c1   : > { %v1173_v53 = vadd.f32 %v3095_v5, %v1013_v29  ;;  %v1209_v35 = vadd.f32 %v3093_v43, %v1102_v30  ;;  %v2433_v25 = vpop.eup %2432 }
 0x1c3   : > { %v2167_v36 = vpack.c.bf16 %v1173_v53, %v1172_v31  ;;  %2434 = vtanh.f32 %v1209_v35  ;;  %v1296_v53 = vld [vmem:[%s3366_s7] sm:$0x3] }
 0x1c4   : > { %2436 = vtanh.f32 %v3067_v16  ;;  %v747_v16 = vadd.f32 %v3008_v32, %v3082_v63  ;;  %v3172_v35 = vperm.slane %v1296_v53, 0  ;;  %v3174_v41 = vperm.slane %v1296_v53, 1 }
 0x1c5   : > { %2227 = vst [vmem:[%s3104_s18 + $0x20] sm:$0xff] %v2167_v36   ;;  %1055 = vmatmul.bf16.gmra.mxu2 %v883_v34  ;;  %1144 = vmatmul.bf16.gmra.mxu3 %v883_v34  ;;  %2438 = vtanh.f32 %v831_v37 }
 0x1c6   : > { %v836_v57 = vadd.f32 %v3084_v0, %v747_v16 }
 0x1c8   : > { %v1016_v38 = vpop.f32.mrf.mxu2  ;;  %v1105_v40 = vpop.f32.mrf.mxu3 }
 0x1c9   : > { %v2435_v42 = vpop.eup %2434  ;;  %v1210_v18 = vadd.f32 %v3093_v43, %v1105_v40  ;;  %v1174_v59 = vadd.f32 %v3095_v5, %v1016_v38 }
 0x1ca   : > { %v1268_v44 = vpack.c.bf16 %v2435_v42, %v2433_v25  ;;  %v2437_v45 = vpop.eup %2436 }
 0x1cb   : > { %v2439_v46 = vpop.eup %2438  ;;  %2440 = vtanh.f32 %v1210_v18 }
 0x1cc   : > { %1410 = vmatmul.bf16.gmra.mxu0 %v1268_v44  ;;  %1499 = vmatmul.bf16.gmra.mxu1 %v1268_v44  ;;  %v884_v56 = vpack.c.bf16 %v2439_v46, %v2437_v45 }
 0x1d0   : > { %v1018_v47 = vpop.f32.mrf.mxu2  ;;  %v1107_v48 = vpop.f32.mrf.mxu3 }
 0x1d1   : > { %v1175_v19 = vadd.f32 %v3095_v5, %v1018_v47  ;;  %v1211_v54 = vadd.f32 %v3093_v43, %v1107_v48  ;;  %v2441_v58 = vpop.eup %2440 }
 0x1d3   : > { %v2172_v55 = vpack.c.bf16 %v1175_v19, %v1174_v59  ;;  %2442 = vtanh.f32 %v1211_v54 }
 0x1d4   : > { %2444 = vtanh.f32 %v3076_v39 }
 0x1d5   : > { %2228 = vst [vmem:[%s3104_s18 + $0x28] sm:$0xff] %v2172_v55   ;;  %1060 = vmatmul.bf16.gmra.mxu2 %v884_v56  ;;  %1149 = vmatmul.bf16.gmra.mxu3 %v884_v56  ;;  %2446 = vtanh.f32 %v836_v57 }
 0x1d8   : > { %v1021_v60 = vpop.f32.mrf.mxu2  ;;  %v1110_v61 = vpop.f32.mrf.mxu3 }
 0x1d9   : > { %v2443_v52 = vpop.eup %2442  ;;  %v1212_v32 = vadd.f32 %v3093_v43, %v1110_v61  ;;  %v1176_v4 = vadd.f32 %v3095_v5, %v1021_v60 }
 0x1da   : > { %v1269_v62 = vpack.c.bf16 %v2443_v52, %v2441_v58  ;;  %v2445_v63 = vpop.eup %2444 }
 0x1db   : > { %v2447_v1 = vpop.eup %2446  ;;  %2448 = vtanh.f32 %v1212_v32 }
 0x1dc   : > { %1415 = vmatmul.bf16.gmra.mxu0 %v1269_v62  ;;  %1504 = vmatmul.bf16.gmra.mxu1 %v1269_v62  ;;  %v885_v39 = vpack.c.bf16 %v2447_v1, %v2445_v63 }
 0x1e0   : > { %v1023_v3 = vpop.f32.mrf.mxu2  ;;  %v1112_v50 = vpop.f32.mrf.mxu3 }
 0x1e1   : > { %v1177_v0 = vadd.f32 %v3095_v5, %v1023_v3  ;;  %v1213_v51 = vadd.f32 %v3093_v43, %v1112_v50  ;;  %v2449_v9 = vpop.eup %2448 }
 0x1e3   : > { %v2177_v6 = vpack.c.bf16 %v1177_v0, %v1176_v4  ;;  %2450 = vtanh.f32 %v1213_v51 }
 0x1e5   : > { %2229 = vst [vmem:[%s3104_s18 + $0x30] sm:$0xff] %v2177_v6   ;;  %1065 = vmatmul.bf16.gmra.mxu2 %v885_v39  ;;  %1154 = vmatmul.bf16.gmra.mxu3 %v885_v39 }
 0x1e8   : > { %v1026_v21 = vpop.f32.mrf.mxu2  ;;  %v1115_v7 = vpop.f32.mrf.mxu3 }
 0x1e9   : > { %v2451_v8 = vpop.eup %2450  ;;  %v1214_v10 = vadd.f32 %v3093_v43, %v1115_v7  ;;  %v1178_v2 = vadd.f32 %v3095_v5, %v1026_v21 }
 0x1ea   : > { %v1270_v11 = vpack.c.bf16 %v2451_v8, %v2449_v9 }
 0x1eb   : > { %2452 = vtanh.f32 %v1214_v10 }
 0x1ec   : > { %1420 = vmatmul.bf16.gmra.mxu0 %v1270_v11  ;;  %1509 = vmatmul.bf16.gmra.mxu1 %v1270_v11 }
 0x1f0   : > { %v1028_v12 = vpop.f32.mrf.mxu2  ;;  %v1117_v22 = vpop.f32.mrf.mxu3 }
 0x1f1   : > { %v1179_v14 = vadd.f32 %v3095_v5, %v1028_v12  ;;  %v1215_v13 = vadd.f32 %v3093_v43, %v1117_v22  ;;  %v2453_v17 = vpop.eup %2452 }
 0x1f3   : > { %v2182_v15 = vpack.c.bf16 %v1179_v14, %v1178_v2  ;;  %2454 = vtanh.f32 %v1215_v13 }
 0x1f5   : > { %2230 = vst [vmem:[%s3104_s18 + $0x38] sm:$0xff] %v2182_v15  }
 0x1f8   : > { %v1031_v20 = vpop.f32.mrf.mxu2  ;;  %v1120_v23 = vpop.f32.mrf.mxu3 }
 0x1f9   : > { %v2455_v24 = vpop.eup %2454  ;;  %v1216_v27 = vadd.f32 %v3093_v43, %v1120_v23  ;;  %v1180_v28 = vadd.f32 %v3095_v5, %v1031_v20 }
 0x1fa   : > { %v1271_v26 = vpack.c.bf16 %v2455_v24, %v2453_v17 }
 0x1fb   : > { %2456 = vtanh.f32 %v1216_v27 }
 0x1fc   : > { %1425 = vmatmul.bf16.gmra.mxu0 %v1271_v26  ;;  %1514 = vmatmul.bf16.gmra.mxu1 %v1271_v26 }
 0x200   : > { %v1033_v49 = vpop.f32.mrf.mxu2  ;;  %v1122_v33 = vpop.f32.mrf.mxu3 }
 0x201   : > { %v1181_v29 = vadd.f32 %v3095_v5, %v1033_v49  ;;  %v1217_v30 = vadd.f32 %v3093_v43, %v1122_v33  ;;  %v2457_v36 = vpop.eup %2456 }
 0x203   : > { %v2187_v31 = vpack.c.bf16 %v1181_v29, %v1180_v28  ;;  %2458 = vtanh.f32 %v1217_v30 }
 0x205   : > { %2231 = vst [vmem:[%s3104_s18 + $0x40] sm:$0xff] %v2187_v31  }
 0x208   : > { %v1036_v34 = vpop.f32.mrf.mxu2  ;;  %v1125_v37 = vpop.f32.mrf.mxu3 }
 0x209   : > { %v2459_v25 = vpop.eup %2458  ;;  %v1391_v38 = vpop.f32.mrf.mxu0  ;;  %v1218_v46 = vadd.f32 %v3093_v43, %v1125_v37  ;;  %v1182_v59 = vadd.f32 %v3095_v5, %v1036_v34 }
 0x20a   : > { %v1480_v40 = vpop.f32.mrf.mxu1  ;;  %v1392_v42 = vadd.f32 %v1391_v38, %v3172_v35  ;;  %v1272_v18 = vpack.c.bf16 %v2459_v25, %v2457_v36 }
 0x20b   : > { %v1481_v44 = vadd.f32 %v1480_v40, %v3174_v41  ;;  %2460 = vtanh.f32 %v1218_v46 }
 0x20c   : > { %1430 = vmatmul.bf16.gmra.mxu0 %v1272_v18  ;;  %1519 = vmatmul.bf16.gmra.mxu1 %v1272_v18 }
 0x20d   : > { %v1624_v45 = vpack.c.bf16 %v1481_v44, %v1392_v42 }
 0x20f   : > { %1656 = vst [vmem:[%s3180_s25] sm:$0xff] %v1624_v45 }
 0x210   : > { %v1038_v47 = vpop.f32.mrf.mxu2  ;;  %v1127_v48 = vpop.f32.mrf.mxu3 }
 0x211   : > { %v1183_v19 = vadd.f32 %v3095_v5, %v1038_v47  ;;  %v1219_v54 = vadd.f32 %v3093_v43, %v1127_v48  ;;  %v1393_v16 = vpop.f32.mrf.mxu0  ;;  %v2461_v61 = vpop.eup %2460 }
 0x212   : > { %v1482_v55 = vpop.f32.mrf.mxu1  ;;  %v1394_v56 = vadd.f32 %v1393_v16, %v3172_v35 }
 0x213   : > { %v1483_v57 = vadd.f32 %v1482_v55, %v3174_v41  ;;  %v2192_v58 = vpack.c.bf16 %v1183_v19, %v1182_v59  ;;  %2462 = vtanh.f32 %v1219_v54 }
 0x215   : > { %v1625_v60 = vpack.c.bf16 %v1483_v57, %v1394_v56  ;;  %2232 = vst [vmem:[%s3104_s18 + $0x48] sm:$0xff] %v2192_v58  }
 0x217   : > { %1657 = vst [vmem:[%s3180_s25 + $0x8] sm:$0xff] %v1625_v60 }
 0x218   : > { %v1041_v52 = vpop.f32.mrf.mxu2  ;;  %v1130_v62 = vpop.f32.mrf.mxu3 }
 0x219   : > { %v2463_v32 = vpop.eup %2462  ;;  %v1396_v63 = vpop.f32.mrf.mxu0  ;;  %v1220_v51 = vadd.f32 %v3093_v43, %v1130_v62  ;;  %v1184_v9 = vadd.f32 %v3095_v5, %v1041_v52 }
 0x21a   : > { %v1485_v1 = vpop.f32.mrf.mxu1  ;;  %v1397_v3 = vadd.f32 %v1396_v63, %v3172_v35  ;;  %v1273_v4 = vpack.c.bf16 %v2463_v32, %v2461_v61 }
 0x21b   : > { %v1486_v50 = vadd.f32 %v1485_v1, %v3174_v41  ;;  %2464 = vtanh.f32 %v1220_v51 }
 0x21c   : > { %1435 = vmatmul.bf16.gmra.mxu0 %v1273_v4  ;;  %1524 = vmatmul.bf16.gmra.mxu1 %v1273_v4 }
 0x21d   : > { %v1626_v0 = vpack.c.bf16 %v1486_v50, %v1397_v3 }
 0x21f   : > { %1658 = vst [vmem:[%s3180_s25 + $0x10] sm:$0xff] %v1626_v0 }
 0x220   : > { %v1043_v6 = vpop.f32.mrf.mxu2  ;;  %v1132_v39 = vpop.f32.mrf.mxu3 }
 0x221   : > { %v1185_v21 = vadd.f32 %v3095_v5, %v1043_v6  ;;  %v1221_v7 = vadd.f32 %v3093_v43, %v1132_v39  ;;  %v1398_v8 = vpop.f32.mrf.mxu0  ;;  %v2465_v14 = vpop.eup %2464 }
 0x222   : > { %v1487_v11 = vpop.f32.mrf.mxu1  ;;  %v1399_v10 = vadd.f32 %v1398_v8, %v3172_v35 }
 0x223   : > { %v1488_v12 = vadd.f32 %v1487_v11, %v3174_v41  ;;  %v2197_v22 = vpack.c.bf16 %v1185_v21, %v1184_v9  ;;  %2466 = vtanh.f32 %v1221_v7 }
 0x225   : > { %v1627_v2 = vpack.c.bf16 %v1488_v12, %v1399_v10  ;;  %2233 = vst [vmem:[%s3104_s18 + $0x50] sm:$0xff] %v2197_v22  }
 0x227   : > { %1659 = vst [vmem:[%s3180_s25 + $0x18] sm:$0xff] %v1627_v2 }
 0x228   : > { %v1046_v13 = vpop.f32.mrf.mxu2  ;;  %v1135_v15 = vpop.f32.mrf.mxu3 }
 0x229   : > { %v2467_v17 = vpop.eup %2466  ;;  %v1401_v20 = vpop.f32.mrf.mxu0  ;;  %v1222_v33 = vadd.f32 %v3093_v43, %v1135_v15  ;;  %v1186_v30 = vadd.f32 %v3095_v5, %v1046_v13 }
 0x22a   : > { %v1490_v23 = vpop.f32.mrf.mxu1  ;;  %v1402_v24 = vadd.f32 %v1401_v20, %v3172_v35  ;;  %v1274_v27 = vpack.c.bf16 %v2467_v17, %v2465_v14 }
 0x22b   : > { %v1491_v26 = vadd.f32 %v1490_v23, %v3174_v41  ;;  %2468 = vtanh.f32 %v1222_v33 }
 0x22c   : > { %1440 = vmatmul.bf16.gmra.mxu0 %v1274_v27  ;;  %1529 = vmatmul.bf16.gmra.mxu1 %v1274_v27 }
 0x22d   : > { %v1628_v49 = vpack.c.bf16 %v1491_v26, %v1402_v24 }
 0x22f   : > { %1660 = vst [vmem:[%s3180_s25 + $0x20] sm:$0xff] %v1628_v49 }
 0x230   : > { %v1048_v28 = vpop.f32.mrf.mxu2  ;;  %v1137_v29 = vpop.f32.mrf.mxu3 }
 0x231   : > { %v1187_v31 = vadd.f32 %v3095_v5, %v1048_v28  ;;  %v1223_v53 = vadd.f32 %v3093_v43, %v1137_v29  ;;  %v1403_v36 = vpop.f32.mrf.mxu0  ;;  %v2469_v42 = vpop.eup %2468 }
 0x232   : > { %v1492_v34 = vpop.f32.mrf.mxu1  ;;  %v1404_v37 = vadd.f32 %v1403_v36, %v3172_v35 }
 0x233   : > { %v1493_v25 = vadd.f32 %v1492_v34, %v3174_v41  ;;  %v2202_v38 = vpack.c.bf16 %v1187_v31, %v1186_v30  ;;  %2470 = vtanh.f32 %v1223_v53 }
 0x235   : > { %v1629_v40 = vpack.c.bf16 %v1493_v25, %v1404_v37  ;;  %2234 = vst [vmem:[%s3104_s18 + $0x58] sm:$0xff] %v2202_v38  }
 0x237   : > { %1661 = vst [vmem:[%s3180_s25 + $0x28] sm:$0xff] %v1629_v40 }
 0x238   : > { %v1051_v44 = vpop.f32.mrf.mxu2  ;;  %v1140_v18 = vpop.f32.mrf.mxu3 }
 0x239   : > { %v2471_v45 = vpop.eup %2470  ;;  %v1406_v46 = vpop.f32.mrf.mxu0  ;;  %v1224_v16 = vadd.f32 %v3093_v43, %v1140_v18  ;;  %v1188_v57 = vadd.f32 %v3095_v5, %v1051_v44 }
 0x23a   : > { %v1495_v47 = vpop.f32.mrf.mxu1  ;;  %v1407_v48 = vadd.f32 %v1406_v46, %v3172_v35  ;;  %v1275_v19 = vpack.c.bf16 %v2471_v45, %v2469_v42 }
 0x23b   : > { %v1496_v59 = vadd.f32 %v1495_v47, %v3174_v41  ;;  %2472 = vtanh.f32 %v1224_v16 }
 0x23c   : > { %1445 = vmatmul.bf16.gmra.mxu0 %v1275_v19  ;;  %1534 = vmatmul.bf16.gmra.mxu1 %v1275_v19 }
 0x23d   : > { %v1630_v54 = vpack.c.bf16 %v1496_v59, %v1407_v48 }
 0x23f   : > { %1662 = vst [vmem:[%s3180_s25 + $0x30] sm:$0xff] %v1630_v54 }
 0x240   : > { %v1053_v55 = vpop.f32.mrf.mxu2  ;;  %v1142_v56 = vpop.f32.mrf.mxu3 }
 0x241   : > { %v1189_v58 = vadd.f32 %v3095_v5, %v1053_v55  ;;  %v1225_v60 = vadd.f32 %v3093_v43, %v1142_v56  ;;  %v1408_v61 = vpop.f32.mrf.mxu0  ;;  %v2473_v3 = vpop.eup %2472 }
 0x242   : > { %v1497_v52 = vpop.f32.mrf.mxu1  ;;  %v1409_v62 = vadd.f32 %v1408_v61, %v3172_v35 }
 0x243   : > { %v1498_v32 = vadd.f32 %v1497_v52, %v3174_v41  ;;  %v2207_v63 = vpack.c.bf16 %v1189_v58, %v1188_v57  ;;  %2474 = vtanh.f32 %v1225_v60 }
 0x245   : > { %v1631_v1 = vpack.c.bf16 %v1498_v32, %v1409_v62  ;;  %2235 = vst [vmem:[%s3104_s18 + $0x60] sm:$0xff] %v2207_v63  }
 0x247   : > { %1663 = vst [vmem:[%s3180_s25 + $0x38] sm:$0xff] %v1631_v1 }
 0x248   : > { %v1056_v50 = vpop.f32.mrf.mxu2  ;;  %v1145_v4 = vpop.f32.mrf.mxu3 }
 0x249   : > { %v2475_v0 = vpop.eup %2474  ;;  %v1411_v51 = vpop.f32.mrf.mxu0  ;;  %v1226_v8 = vadd.f32 %v3093_v43, %v1145_v4  ;;  %v1190_v12 = vadd.f32 %v3095_v5, %v1056_v50 }
 0x24a   : > { %v1500_v6 = vpop.f32.mrf.mxu1  ;;  %v1412_v39 = vadd.f32 %v1411_v51, %v3172_v35  ;;  %v1276_v21 = vpack.c.bf16 %v2475_v0, %v2473_v3 }
 0x24b   : > { %v1501_v9 = vadd.f32 %v1500_v6, %v3174_v41  ;;  %2476 = vtanh.f32 %v1226_v8 }
 0x24c   : > { %1450 = vmatmul.bf16.gmra.mxu0 %v1276_v21  ;;  %1539 = vmatmul.bf16.gmra.mxu1 %v1276_v21 }
 0x24d   : > { %v1632_v7 = vpack.c.bf16 %v1501_v9, %v1412_v39 }
 0x24f   : > { %1664 = vst [vmem:[%s3180_s25 + $0x40] sm:$0xff] %v1632_v7 }
 0x250   : > { %v1058_v11 = vpop.f32.mrf.mxu2  ;;  %v1147_v10 = vpop.f32.mrf.mxu3 }
 0x251   : > { %v1191_v22 = vadd.f32 %v3095_v5, %v1058_v11  ;;  %v1227_v2 = vadd.f32 %v3093_v43, %v1147_v10  ;;  %v1413_v14 = vpop.f32.mrf.mxu0  ;;  %v2477_v24 = vpop.eup %2476 }
 0x252   : > { %v1502_v13 = vpop.f32.mrf.mxu1  ;;  %v1414_v15 = vadd.f32 %v1413_v14, %v3172_v35 }
 0x253   : > { %v1503_v17 = vadd.f32 %v1502_v13, %v3174_v41  ;;  %v2212_v20 = vpack.c.bf16 %v1191_v22, %v1190_v12  ;;  %2478 = vtanh.f32 %v1227_v2 }
 0x255   : > { %v1633_v23 = vpack.c.bf16 %v1503_v17, %v1414_v15  ;;  %2236 = vst [vmem:[%s3104_s18 + $0x68] sm:$0xff] %v2212_v20  }
 0x257   : > { %1665 = vst [vmem:[%s3180_s25 + $0x48] sm:$0xff] %v1633_v23 }
 0x258   : > { %v1061_v26 = vpop.f32.mrf.mxu2  ;;  %v1150_v27 = vpop.f32.mrf.mxu3 }
 0x259   : > { %v2479_v49 = vpop.eup %2478  ;;  %v1416_v33 = vpop.f32.mrf.mxu0  ;;  %v1228_v36 = vadd.f32 %v3093_v43, %v1150_v27  ;;  %v1192_v25 = vadd.f32 %v3095_v5, %v1061_v26 }
 0x25a   : > { %v1505_v28 = vpop.f32.mrf.mxu1  ;;  %v1417_v29 = vadd.f32 %v1416_v33, %v3172_v35  ;;  %v1277_v31 = vpack.c.bf16 %v2479_v49, %v2477_v24 }
 0x25b   : > { %v1506_v30 = vadd.f32 %v1505_v28, %v3174_v41  ;;  %2480 = vtanh.f32 %v1228_v36 }
 0x25c   : > { %1455 = vmatmul.bf16.gmra.mxu0 %v1277_v31  ;;  %1544 = vmatmul.bf16.gmra.mxu1 %v1277_v31 }
 0x25d   : > { %v1634_v53 = vpack.c.bf16 %v1506_v30, %v1417_v29 }
 0x25f   : > { %1666 = vst [vmem:[%s3180_s25 + $0x50] sm:$0xff] %v1634_v53 }
 0x260   : > { %v1063_v34 = vpop.f32.mrf.mxu2  ;;  %v1152_v37 = vpop.f32.mrf.mxu3 }
 0x261   : > { %v1193_v38 = vadd.f32 %v3095_v5, %v1063_v34  ;;  %v1229_v40 = vadd.f32 %v3093_v43, %v1152_v37  ;;  %v1418_v42 = vpop.f32.mrf.mxu0  ;;  %v2481_v48 = vpop.eup %2480 }
 0x262   : > { %v1507_v44 = vpop.f32.mrf.mxu1  ;;  %v1419_v18 = vadd.f32 %v1418_v42, %v3172_v35 }
 0x263   : > { %v1508_v45 = vadd.f32 %v1507_v44, %v3174_v41  ;;  %v2217_v46 = vpack.c.bf16 %v1193_v38, %v1192_v25  ;;  %2482 = vtanh.f32 %v1229_v40 }
 0x265   : > { %v1635_v47 = vpack.c.bf16 %v1508_v45, %v1419_v18  ;;  %2237 = vst [vmem:[%s3104_s18 + $0x70] sm:$0xff] %v2217_v46  }
 0x267   : > { %1667 = vst [vmem:[%s3180_s25 + $0x58] sm:$0xff] %v1635_v47 }
 0x268   : > { %v1066_v59 = vpop.f32.mrf.mxu2  ;;  %v1155_v19 = vpop.f32.mrf.mxu3 }
 0x269   : > { %v2483_v54 = vpop.eup %2482  ;;  %v1421_v16 = vpop.f32.mrf.mxu0  ;;  %v1230_v61 = vadd.f32 %v3093_v43, %v1155_v19  ;;  %v1194_v32 = vadd.f32 %v3095_v5, %v1066_v59 }
 0x26a   : > { %v1510_v55 = vpop.f32.mrf.mxu1  ;;  %v1422_v56 = vadd.f32 %v1421_v16, %v3172_v35  ;;  %v1278_v58 = vpack.c.bf16 %v2483_v54, %v2481_v48 }
 0x26b   : > { %v1511_v57 = vadd.f32 %v1510_v55, %v3174_v41  ;;  %2484 = vtanh.f32 %v1230_v61 }
 0x26c   : > { %1460 = vmatmul.bf16.gmra.mxu0 %v1278_v58  ;;  %1549 = vmatmul.bf16.gmra.mxu1 %v1278_v58 }
 0x26d   : > { %v1636_v60 = vpack.c.bf16 %v1511_v57, %v1422_v56 }
 0x26f   : > { %1668 = vst [vmem:[%s3180_s25 + $0x60] sm:$0xff] %v1636_v60 }
 0x270   : > { %v1068_v52 = vpop.f32.mrf.mxu2  ;;  %v1157_v62 = vpop.f32.mrf.mxu3 }
 0x271   : > { %v1195_v63 = vadd.f32 %v3095_v5, %v1068_v52  ;;  %v1231_v1 = vadd.f32 %v3093_v43, %v1157_v62  ;;  %v1423_v3 = vpop.f32.mrf.mxu0  ;;  %v2485_v39 = vpop.eup %2484 }
 0x272   : > { %v1512_v50 = vpop.f32.mrf.mxu1  ;;  %v1424_v4 = vadd.f32 %v1423_v3, %v3172_v35 }
 0x273   : > { %v1513_v0 = vadd.f32 %v1512_v50, %v3174_v41  ;;  %v2222_v51 = vpack.c.bf16 %v1195_v63, %v1194_v32  ;;  %2486 = vtanh.f32 %v1231_v1 }
 0x275   : > { %v1637_v6 = vpack.c.bf16 %v1513_v0, %v1424_v4  ;;  %2238 = vst [vmem:[%s3104_s18 + $0x78] sm:$0xff] %v2222_v51  }
 0x277   : > { %1669 = vst [vmem:[%s3180_s25 + $0x68] sm:$0xff] %v1637_v6 }
 0x279   : > { %v2487_v9 = vpop.eup %2486  ;;  %v1426_v21 = vpop.f32.mrf.mxu0 }
 0x27a   : > { %v1515_v5 = vpop.f32.mrf.mxu1  ;;  %v1427_v43 = vadd.f32 %v1426_v21, %v3172_v35  ;;  %v1279_v8 = vpack.c.bf16 %v2487_v9, %v2485_v39 }
 0x27b   : > { %v1516_v7 = vadd.f32 %v1515_v5, %v3174_v41 }
 0x27c   : > { %1465 = vmatmul.bf16.gmra.mxu0 %v1279_v8  ;;  %1554 = vmatmul.bf16.gmra.mxu1 %v1279_v8 }
 0x27d   : > { %v1638_v11 = vpack.c.bf16 %v1516_v7, %v1427_v43 }
 0x27f   : > { %1670 = vst [vmem:[%s3180_s25 + $0x70] sm:$0xff] %v1638_v11 }
 0x281   : > { %v1428_v10 = vpop.f32.mrf.mxu0 }
 0x282   : > { %v1517_v12 = vpop.f32.mrf.mxu1  ;;  %v1429_v22 = vadd.f32 %v1428_v10, %v3172_v35 }
 0x283   : > { %v1518_v2 = vadd.f32 %v1517_v12, %v3174_v41 }
 0x285   : > { %v1639_v14 = vpack.c.bf16 %v1518_v2, %v1429_v22 }
 0x287   : > { %1671 = vst [vmem:[%s3180_s25 + $0x78] sm:$0xff] %v1639_v14 }
 0x289   : > { %v1431_v13 = vpop.f32.mrf.mxu0 }
 0x28a   : > { %v1520_v15 = vpop.f32.mrf.mxu1 }
 0x28b   : > { %2665 = shalt.err (!%p2662_p10)
}
 0x28c   : > { %s2756_s23 = smov 64   ;;  %s2757_s3 = smov 4   ;;  %v1432_v17 = vadd.f32 %v1431_v13, %v3172_v35  ;;  %v1521_v20 = vadd.f32 %v1520_v15, %v3174_v41 }
 0x28d   : > { %2273 = dma.vmem_to_hbm [thread:$0]  (%p2893_p0), %s1707_s1, 2048, %s1709_s15, %s1689_s20, %s2756_s23, %s2756_s23, %s2757_s3  }
 0x28e   : > { %v1640_v23 = vpack.c.bf16 %v1521_v20, %v1432_v17  ;;  %s2143_s4 = sshll.u32 %s2831_s13, 8  ;;  %s1724_s14 = sshll.u32 %s3180_s25, 4  ;;  %s1725_s14 = int_to_ptr.vmem [resolvable:$true] %s1724_s14 }
 0x28f   : > { %s1723_s20 = scalar_lea.hbm %s3368_s9, %s2143_s4  ;;  %s1694_s13 = scalar_lea.sflag [#allocation13], %s2923_s22 }
 0x290   : > { %1672 = vst [vmem:[%s3180_s25 + $0x80] sm:$0xff] %v1640_v23  ;;  %s1726_s24 = sshll.u32 %s1723_s20, 4  ;;  %s2686_s18 = scalar_lea.hbm %s3368_s9, 1024  ;;  %s1727_s24 = int_to_ptr.hbm [resolvable:$true] %s1726_s24 }
 0x291   : > { %v1433_v24 = vpop.f32.mrf.mxu0  ;;  %s2680_s27 = sshra.s32 %s1727_s24, 4  ;;  %s2681_s27 = int_to_ptr.hbm [resolvable:$true] %s2680_s27 }
 0x292   : > { %v1522_v26 = vpop.f32.mrf.mxu1  ;;  %v1434_v27 = vadd.f32 %v1433_v24, %v3172_v35  ;;  %s2682_s28 = scalar_lea.hbm %s2681_s27, 256  ;;  %p2687_p3 = scmp.lt.s32.totalorder %s2681_s27, %s3368_s9 }
 0x293   : > { %v1523_v49 = vadd.f32 %v1522_v26, %v3174_v41  ;;  %p2683_p11 = scmp.ne.s32.totalorder %s2681_s27, %s2682_s28  ;;  %p2688_p5 = scmp.lt.s32.totalorder %s2686_s18, %s2682_s28 }
 0x295   : > { %v1641_v33 = vpack.c.bf16 %v1523_v49, %v1434_v27  ;;  %p2684_p12 = pnand %p2683_p11, %p2893_p0  ;;  %p2689_p1 = por %p2688_p5, %p2687_p3 }
 0x297   : > { %1673 = vst [vmem:[%s3180_s25 + $0x88] sm:$0xff] %v1641_v33  ;;  %p2685_p13 = pneg %p2684_p12 }
 0x299   : > { %v1436_v28 = vpop.f32.mrf.mxu0  ;;  %p2690_p4 = pnand %p2689_p1, %p2685_p13 }
 0x29a   : > { %v1525_v29 = vpop.f32.mrf.mxu1  ;;  %v1437_v30 = vadd.f32 %v1436_v28, %v3172_v35 }
 0x29b   : > { %v1526_v31 = vadd.f32 %v1525_v29, %v3174_v41 }
 0x29d   : > { %v1642_v53 = vpack.c.bf16 %v1526_v31, %v1437_v30 }
 0x29f   : > { %1674 = vst [vmem:[%s3180_s25 + $0x90] sm:$0xff] %v1642_v53 }
 0x2a1   : > { %v1438_v36 = vpop.f32.mrf.mxu0 }
 0x2a2   : > { %v1527_v34 = vpop.f32.mrf.mxu1  ;;  %v1439_v37 = vadd.f32 %v1438_v36, %v3172_v35 }
 0x2a3   : > { %v1528_v25 = vadd.f32 %v1527_v34, %v3174_v41 }
 0x2a5   : > { %v1643_v38 = vpack.c.bf16 %v1528_v25, %v1439_v37 }
 0x2a7   : > { %1675 = vst [vmem:[%s3180_s25 + $0x98] sm:$0xff] %v1643_v38 }
 0x2a9   : > { %v1441_v40 = vpop.f32.mrf.mxu0 }
 0x2aa   : > { %v1530_v42 = vpop.f32.mrf.mxu1  ;;  %v1442_v44 = vadd.f32 %v1441_v40, %v3172_v35 }
 0x2ab   : > { %v1531_v18 = vadd.f32 %v1530_v42, %v3174_v41 }
 0x2ad   : > { %v1644_v45 = vpack.c.bf16 %v1531_v18, %v1442_v44 }
 0x2af   : > { %1676 = vst [vmem:[%s3180_s25 + $0xa0] sm:$0xff] %v1644_v45 }
 0x2b1   : > { %v1443_v46 = vpop.f32.mrf.mxu0 }
 0x2b2   : > { %v1532_v47 = vpop.f32.mrf.mxu1  ;;  %v1444_v48 = vadd.f32 %v1443_v46, %v3172_v35 }
 0x2b3   : > { %v1533_v59 = vadd.f32 %v1532_v47, %v3174_v41 }
 0x2b5   : > { %v1645_v19 = vpack.c.bf16 %v1533_v59, %v1444_v48 }
 0x2b7   : > { %1677 = vst [vmem:[%s3180_s25 + $0xa8] sm:$0xff] %v1645_v19 }
 0x2b9   : > { %v1446_v54 = vpop.f32.mrf.mxu0 }
 0x2ba   : > { %v1535_v16 = vpop.f32.mrf.mxu1  ;;  %v1447_v55 = vadd.f32 %v1446_v54, %v3172_v35 }
 0x2bb   : > { %v1536_v56 = vadd.f32 %v1535_v16, %v3174_v41 }
 0x2bd   : > { %v1646_v57 = vpack.c.bf16 %v1536_v56, %v1447_v55 }
 0x2bf   : > { %1678 = vst [vmem:[%s3180_s25 + $0xb0] sm:$0xff] %v1646_v57 }
 0x2c1   : > { %v1448_v58 = vpop.f32.mrf.mxu0 }
 0x2c2   : > { %v1537_v60 = vpop.f32.mrf.mxu1  ;;  %v1449_v61 = vadd.f32 %v1448_v58, %v3172_v35 }
 0x2c3   : > { %v1538_v52 = vadd.f32 %v1537_v60, %v3174_v41 }
 0x2c5   : > { %v1647_v62 = vpack.c.bf16 %v1538_v52, %v1449_v61 }
 0x2c7   : > { %1679 = vst [vmem:[%s3180_s25 + $0xb8] sm:$0xff] %v1647_v62 }
 0x2c9   : > { %v1451_v32 = vpop.f32.mrf.mxu0 }
 0x2ca   : > { %v1540_v63 = vpop.f32.mrf.mxu1  ;;  %v1452_v1 = vadd.f32 %v1451_v32, %v3172_v35 }
 0x2cb   : > { %v1541_v3 = vadd.f32 %v1540_v63, %v3174_v41 }
 0x2cd   : > { %v1648_v50 = vpack.c.bf16 %v1541_v3, %v1452_v1 }
 0x2cf   : > { %1680 = vst [vmem:[%s3180_s25 + $0xc0] sm:$0xff] %v1648_v50 }
 0x2d1   : > { %v1453_v4 = vpop.f32.mrf.mxu0 }
 0x2d2   : > { %v1542_v0 = vpop.f32.mrf.mxu1  ;;  %v1454_v51 = vadd.f32 %v1453_v4, %v3172_v35 }
 0x2d3   : > { %v1543_v6 = vadd.f32 %v1542_v0, %v3174_v41 }
 0x2d5   : > { %v1649_v39 = vpack.c.bf16 %v1543_v6, %v1454_v51 }
 0x2d7   : > { %1681 = vst [vmem:[%s3180_s25 + $0xc8] sm:$0xff] %v1649_v39 }
 0x2d9   : > { %v1456_v9 = vpop.f32.mrf.mxu0 }
 0x2da   : > { %v1545_v21 = vpop.f32.mrf.mxu1  ;;  %v1457_v5 = vadd.f32 %v1456_v9, %v3172_v35 }
 0x2db   : > { %v1546_v43 = vadd.f32 %v1545_v21, %v3174_v41 }
 0x2dd   : > { %v1650_v7 = vpack.c.bf16 %v1546_v43, %v1457_v5 }
 0x2df   : > { %1682 = vst [vmem:[%s3180_s25 + $0xd0] sm:$0xff] %v1650_v7 }
 0x2e1   : > { %v1458_v8 = vpop.f32.mrf.mxu0 }
 0x2e2   : > { %v1547_v11 = vpop.f32.mrf.mxu1  ;;  %v1459_v10 = vadd.f32 %v1458_v8, %v3172_v35 }
 0x2e3   : > { %v1548_v12 = vadd.f32 %v1547_v11, %v3174_v41 }
 0x2e5   : > { %v1651_v22 = vpack.c.bf16 %v1548_v12, %v1459_v10 }
 0x2e7   : > { %1683 = vst [vmem:[%s3180_s25 + $0xd8] sm:$0xff] %v1651_v22 }
 0x2e9   : > { %v1461_v2 = vpop.f32.mrf.mxu0 }
 0x2ea   : > { %v1550_v14 = vpop.f32.mrf.mxu1  ;;  %v1462_v13 = vadd.f32 %v1461_v2, %v3172_v35 }
 0x2eb   : > { %v1551_v15 = vadd.f32 %v1550_v14, %v3174_v41 }
 0x2ed   : > { %v1652_v17 = vpack.c.bf16 %v1551_v15, %v1462_v13 }
 0x2ef   : > { %1684 = vst [vmem:[%s3180_s25 + $0xe0] sm:$0xff] %v1652_v17 }
 0x2f1   : > { %v1463_v20 = vpop.f32.mrf.mxu0 }
 0x2f2   : > { %v1552_v23 = vpop.f32.mrf.mxu1  ;;  %v1464_v24 = vadd.f32 %v1463_v20, %v3172_v35 }
 0x2f3   : > { %v1553_v26 = vadd.f32 %v1552_v23, %v3174_v41 }
 0x2f5   : > { %v1653_v27 = vpack.c.bf16 %v1553_v26, %v1464_v24 }
 0x2f7   : > { %1685 = vst [vmem:[%s3180_s25 + $0xe8] sm:$0xff] %v1653_v27 }
 0x2f9   : > { %v1466_v49 = vpop.f32.mrf.mxu0 }
 0x2fa   : > { %v1555_v33 = vpop.f32.mrf.mxu1  ;;  %v1467_v28 = vadd.f32 %v1466_v49, %v3172_v35 }
 0x2fb   : > { %v1556_v29 = vadd.f32 %v1555_v33, %v3174_v41 }
 0x2fd   : > { %v1654_v30 = vpack.c.bf16 %v1556_v29, %v1467_v28 }
 0x2ff   : > { %1686 = vst [vmem:[%s3180_s25 + $0xf0] sm:$0xff] %v1654_v30 }
 0x301   : > { %v1468_v31 = vpop.f32.mrf.mxu0 }
 0x302   : > { %v1557_v53 = vpop.f32.mrf.mxu1  ;;  %v1469_v36 = vadd.f32 %v1468_v31, %v3172_v35 }
 0x303   : > { %v1558_v34 = vadd.f32 %v1557_v53, %v3174_v41 }
 0x305   : > { %v1655_v37 = vpack.c.bf16 %v1558_v34, %v1469_v36 }
 0x307   : > { %1687 = vst [vmem:[%s3180_s25 + $0xf8] sm:$0xff] %v1655_v37 }
 0x308   : > { %2693 = shalt.err (!%p2690_p4)
}
 0x309   : > { %s2758_s22 = smov 128   ;;  %s2759_s25 = smov 8  }
 0x30a   : > { %2274 = dma.vmem_to_hbm [thread:$0]  (%p2893_p0), %s1725_s14, 4096, %s1727_s24, %s1694_s13, %s2758_s22, %s2758_s22, %s2759_s25  }
 0x30b PF: > { %p2310_p8 = scmp.ge.s32.totalorder %s2744_s12, 2  ;;  %s1741_s4 = sand.u32 1, %s2732_s30  }
 0x30c   : > { %s1742_s1 = scalar_lea.sflag [#allocation4], %s1741_s4 }
 0x30d   : > { %p2295_p2 = pnand %p2310_p8, %p2845_p6 }
 0x30f   : > { %p2296_p7 = pneg %p2295_p2 }
 0x311   : > { %2723 = dma.done.wait (%p2296_p7), %s1742_s1, 2048  }
 0x312   : > { %2725 = vsyncadd (%p2296_p7), %s1742_s1, 4294965248  ;;  %s1752_s15 = scalar_lea.sflag [#allocation13], %s1741_s4 }
 0x313   : > { %2727 = dma.done.wait (%p2296_p7), %s1752_s15, 4096  }
 0x314   : > { %2729 = vsyncadd (%p2296_p7), %s1752_s15, 4294963200  ;;  %p28_p0 = scmp.ge.s32.totalorder %s2883_s17, 6   ;;  %s3381_s30 = smov %s2736_s10 }
 0x315   : > { %s3382_s10 = smov %s2740_s11  ;;  %s3383_s11 = smov %s2899_s21 }
 0x316   : > { %s3384_s12 = smov %s2883_s17  ;;  %30 = sbr.rel (!%p28_p0) target bundleno = 13 (0xd), region = 130 }
 0x31b   :  { %1758 = vsyncpa [#allocation3], 1 }
 0x31c   :  { %1760 = vsyncpa [#allocation3 + $0x1], 1 }
 0x31d   :  { %1761 = vsyncpa [#allocation6], 1 }
 0x31e   :  { %1762 = vsyncpa [#allocation9], 1 }
 0x31f   :  { %1763 = vsyncpa [#allocation4], 1 }
 0x320   :  { %1765 = vsyncpa [#allocation4 + $0x1], 1 }
 0x321   :  { %1766 = vsyncpa [#allocation13], 1 }
 0x322   :  { %1768 = vsyncpa [#allocation13 + $0x1], 1 }

</bundles_post_ra>
